<compile_context>
chip_gen: v7x
topology: tpu7x:2x2x1
jax: 0.10.0
libtpu: 0.0.40
codegen_flags: <defaults>
</compile_context>

<pallas_src>
import math

import jax
import jax.numpy as jnp
from jax.experimental import pallas as pl
from jax.experimental.pallas import tpu as pltpu  # noqa: F401  (kept for TPU-specific knobs)

# ----------------------------- config ---------------------------------------
VOCAB_SIZE = 128
BLOCK_SIZE = 16          # max sequence length (position table size)
NUM_EMBDS  = 64          # C
NUM_HEADS  = 4
HEAD_DIM   = NUM_EMBDS // NUM_HEADS   # == head_size = 16
NUM_BLOCKS = 2
LN_EPS     = 1e-5
# dropout = 0.0 -> nn.Dropout is identity in this deterministic forward.


# --------------------------- kernel helpers ----------------------------------
def _layernorm(x, g, b):
    """x: (N, C); g, b: (1, C). PyTorch nn.LayerNorm semantics (eps=1e-5)."""
    mu = jnp.mean(x, axis=-1, keepdims=True)
    var = jnp.mean((x - mu) * (x - mu), axis=-1, keepdims=True)
    return (x - mu) * jax.lax.rsqrt(var + LN_EPS) * g + b


def _erf(x):
    """Abramowitz-Stegun 7.1.26 erf approximation (|err| < 1.5e-7).

    Uses only exp / abs / where / arithmetic so it lowers cleanly in Mosaic
    while matching PyTorch's exact nn.GELU() to well below test tolerance.
    """
    z = jnp.abs(x)
    t = 1.0 / (1.0 + 0.3275911 * z)
    poly = ((((1.061405429 * t - 1.453152027) * t + 1.421413741) * t
             - 0.284496736) * t + 0.254829592) * t
    y = 1.0 - poly * jnp.exp(-z * z)
    return jnp.where(x < 0.0, -y, y)


def _gelu_exact(x):
    return 0.5 * x * (1.0 + _erf(x * 0.7071067811865476))


def _mm(a_f32, w_bf16):
    """f32 activations x bf16 weights -> f32 accumulation on the MXU."""
    return jnp.dot(a_f32.astype(jnp.bfloat16), w_bf16,
                   preferred_element_type=jnp.float32)


# --------------------------- fused GPT kernel ---------------------------------
def gpt_kernel(x_ref, mask_ref,
               w_attn_ref, w_proj_ref, w_fc_ref, w_out_ref, w_lm_ref,
               vec_ref, b_attn_ref, b_fc_ref, b_lm_ref,
               o_ref):
    """Whole GPT forward for the (tiny) batch.

    x_ref   : (N, C)  f32, N = B*T flattened rows.
    mask_ref: (N, N)  f32 additive causal mask (0 where allowed, -1e30 else).
    o_ref   : (N, V)  f32 logits (V = 128, lane-dense output).
    Weight refs are stacked over layers; all f32 vector params live in a few
    slabs indexed only along the leading axis (no lane slicing of weights).
      vec_ref rows per layer l (base = 6*l):
        +0 ln1_g, +1 ln1_b, +2 b_proj, +3 ln2_g, +4 ln2_b, +5 b_out
      rows 12/13: lnf_g / lnf_b.
    The 1/sqrt(head_dim) scale is pre-folded into the q-columns of
    w_attn / b_attn at pack time.
    """
    x = x_ref[...]                      # (N, C) f32
    mask = mask_ref[...]                # (N, N) f32 additive
    C = NUM_EMBDS
    D = HEAD_DIM

    for l in range(NUM_BLOCKS):         # static unroll over layers
        base = 6 * l

        # ---- attention branch ----
        xn = _layernorm(x, vec_ref[base + 0], vec_ref[base + 1])
        qkv = _mm(xn, w_attn_ref[l]) + b_attn_ref[l]            # (N, 3C) f32

        heads = []
        for h in range(NUM_HEADS):      # static unroll over heads
            lo = h * D
            qh = qkv[:, lo:lo + D]                               # pre-scaled q
            kh = qkv[:, C + lo:C + lo + D]
            vh = qkv[:, 2 * C + lo:2 * C + lo + D]
            # q @ k^T without an explicit transpose (contract dim 1 of both)
            s = jax.lax.dot_general(qh, kh, (((1,), (1,)), ((), ())),
                                    preferred_element_type=jnp.float32)
            s = s + mask
            s = s - jnp.max(s, axis=-1, keepdims=True)
            p = jnp.exp(s)
            p = p * pl.reciprocal(jnp.sum(p, axis=-1, keepdims=True),
                                  approx=True)
            heads.append(jnp.dot(p, vh, preferred_element_type=jnp.float32))

        y = jnp.concatenate(heads, axis=-1)                      # (N, C)
        x = x + _mm(y, w_proj_ref[l]) + vec_ref[base + 2]        # one proj matmul

        # ---- MLP branch ----
        xn2 = _layernorm(x, vec_ref[base + 3], vec_ref[base + 4])
        hdn = _gelu_exact(_mm(xn2, w_fc_ref[l]) + b_fc_ref[l])
        x = x + _mm(hdn, w_out_ref[l]) + vec_ref[base + 5]
        # dropout p=0.0 -> identity

    # ---- final LN + tied lm_head ----
    xn = _layernorm(x, vec_ref[6 * NUM_BLOCKS + 0], vec_ref[6 * NUM_BLOCKS + 1])
    o_ref[...] = _mm(xn, w_lm_ref[...]) + b_lm_ref[...]


# --------------------------- pallas wrapper -----------------------------------
def gpt_forward(tokens, kp):
    """tokens: (B, T) int32, kp = pack_params(...) -> (logits (B, T, V), None)."""
    B, T = tokens.shape
    C, V = NUM_EMBDS, VOCAB_SIZE
    N = B * T

    # Embedding gather is glue (data-dependent row gather), kept in plain JAX.
    tok = jnp.take(kp["wte"], tokens, axis=0)                   # (B, T, C) f32
    pos = kp["wpe"][:T][None, :, :]                             # (1, T, C)
    x = (tok + pos).astype(jnp.float32).reshape(N, C)           # (N, C)

    # Block-diagonal causal additive mask (constant-folded by XLA under jit).
    r = jnp.arange(N, dtype=jnp.int32)[:, None]
    c = jnp.arange(N, dtype=jnp.int32)[None, :]
    allowed = (r // T == c // T) & (c <= r)
    mask = jnp.where(allowed, 0.0, -1e30).astype(jnp.float32)   # (N, N)

    logits = pl.pallas_call(
        gpt_kernel,
        out_shape=jax.ShapeDtypeStruct((N, V), jnp.float32),
        # No grid: the whole (tiny) forward is one invocation; all inputs are
        # mapped as full-array VMEM blocks (total weights ~250 KB).
    )(x, mask,
      kp["w_attn"], kp["w_proj"], kp["w_fc"], kp["w_out"], kp["w_lm"],
      kp["vec"], kp["b_attn"], kp["b_fc"], kp["b_lm"])

    # TODO(synk): cross-entropy loss path (y != None) not needed here.
    return logits.reshape(B, T, V), None


# --------------------------- parameter init / packing -------------------------
def init_params(key):
    """Torch-semantics parameters (all f32, stacked over the layer axis)."""
    C, L, V = NUM_EMBDS, NUM_BLOCKS, VOCAB_SIZE

    def normal(k, shape, std=0.02):
        return (std * jax.random.normal(k, shape)).astype(jnp.float32)

    ks = iter(jax.random.split(key, 32))
    p = {}
    p["wte"] = normal(next(ks), (V, C))            # tied with lm_head weight
    p["wpe"] = normal(next(ks), (BLOCK_SIZE, C))
    p["ln1_g"] = jnp.ones((L, C), jnp.float32)
    p["ln1_b"] = jnp.zeros((L, C), jnp.float32)
    p["w_attn"] = normal(next(ks), (L, C, 3 * C))
    p["b_attn"] = normal(next(ks), (L, 3 * C))
    p["w_proj"] = normal(next(ks), (L, C, C))
    p["b_proj"] = normal(next(ks), (L, C))
    p["ln2_g"] = jnp.ones((L, C), jnp.float32)
    p["ln2_b"] = jnp.zeros((L, C), jnp.float32)
    p["w_fc"] = normal(next(ks), (L, C, 4 * C))
    p["b_fc"] = normal(next(ks), (L, 4 * C))
    p["w_out"] = normal(next(ks), (L, 4 * C, C))
    p["b_out"] = normal(next(ks), (L, C))
    p["lnf_g"] = jnp.ones((C,), jnp.float32)
    p["lnf_b"] = jnp.zeros((C,), jnp.float32)
    p["b_lm"] = normal(next(ks), (V,))
    return p


def pack_params(p):
    """One-time host-side repack into the kernel's layout.

    * bf16 weight casts (MXU inputs), f32 vector params packed into slabs.
    * 1/sqrt(head_dim) folded into the q-columns of w_attn / b_attn
      (exact: 0.25 is a power of two, so bf16 rounding is unchanged).
    * tied lm_head weight (wte.T) pre-materialized in bf16.
    """
    C, L, V = NUM_EMBDS, NUM_BLOCKS, VOCAB_SIZE
    scale = 1.0 / math.sqrt(HEAD_DIM)              # 0.25 exactly
    qscale = jnp.concatenate([jnp.full((C,), scale, jnp.float32),
                              jnp.ones((2 * C,), jnp.float32)])

    vec_rows = []
    for l in range(L):
        vec_rows += [p["ln1_g"][l], p["ln1_b"][l], p["b_proj"][l],
                     p["ln2_g"][l], p["ln2_b"][l], p["b_out"][l]]
    vec_rows += [p["lnf_g"], p["lnf_b"]]
    vec = jnp.stack(vec_rows, axis=0).reshape(len(vec_rows), 1, C)

    return dict(
        wte=p["wte"], wpe=p["wpe"],
        w_attn=(p["w_attn"] * qscale[None, None, :]).astype(jnp.bfloat16),
        b_attn=(p["b_attn"] * qscale[None, :]).reshape(L, 1, 3 * C)
               .astype(jnp.float32),
        w_proj=p["w_proj"].astype(jnp.bfloat16),
        w_fc=p["w_fc"].astype(jnp.bfloat16),
        b_fc=p["b_fc"].reshape(L, 1, 4 * C).astype(jnp.float32),
        w_out=p["w_out"].astype(jnp.bfloat16),
        w_lm=p["wte"].T.astype(jnp.bfloat16),
        b_lm=p["b_lm"].reshape(1, V).astype(jnp.float32),
        vec=vec.astype(jnp.float32),
    )


# --------------------------- pure-JAX reference --------------------------------
def gpt_reference(tokens, p):
    def ln(x, g, b):
        mu = jnp.mean(x, -1, keepdims=True)
        var = jnp.mean((x - mu) ** 2, -1, keepdims=True)
        return (x - mu) * jax.lax.rsqrt(var + LN_EPS) * g + b

    def mm(x, w):
        return jnp.dot(x.astype(jnp.bfloat16), w.astype(jnp.bfloat16),
                       preferred_element_type=jnp.float32)

    B, T = tokens.shape
    C, H, D = NUM_EMBDS, NUM_HEADS, HEAD_DIM
    x = jnp.take(p["wte"], tokens, axis=0) + p["wpe"][:T][None]
    causal = jnp.tril(jnp.ones((T, T), bool))
    for l in range(NUM_BLOCKS):
        xn = ln(x, p["ln1_g"][l], p["ln1_b"][l])
        qkv = mm(xn, p["w_attn"][l]) + p["b_attn"][l]
        q, k, v = jnp.split(qkv, 3, axis=-1)
        q = q.reshape(B, T, H, D).transpose(0, 2, 1, 3)
        k = k.reshape(B, T, H, D).transpose(0, 2, 1, 3)
        v = v.reshape(B, T, H, D).transpose(0, 2, 1, 3)
        s = jnp.einsum("bhqd,bhkd->bhqk", q, k,
                       precision=jax.lax.Precision.HIGHEST) / math.sqrt(D)
        s = jnp.where(causal, s, -1e30)
        pr = jax.nn.softmax(s, axis=-1)
        y = jnp.einsum("bhqk,bhkd->bhqd", pr, v,
                       precision=jax.lax.Precision.HIGHEST)
        y = y.transpose(0, 2, 1, 3).reshape(B, T, C)
        x = x + mm(y, p["w_proj"][l]) + p["b_proj"][l]
        xn2 = ln(x, p["ln2_g"][l], p["ln2_b"][l])
        h = jax.nn.gelu(mm(xn2, p["w_fc"][l]) + p["b_fc"][l], approximate=False)
        x = x + mm(h, p["w_out"][l]) + p["b_out"][l]
    x = ln(x, p["lnf_g"], p["lnf_b"])
    return mm(x, p["wte"].T) + p["b_lm"]


# --------------------------- main ----------------------------------------------
if __name__ == "__main__":
    key = jax.random.PRNGKey(0)
    kparam, kx = jax.random.split(key)
    params = init_params(kparam)
    kernel_params = pack_params(params)

    B, T = 2, 8
    tokens = jax.random.randint(kx, (B, T), 0, VOCAB_SIZE, dtype=jnp.int32)

    fwd = jax.jit(gpt_forward)
    logits, loss = fwd(tokens, kernel_params)
    logits = jax.block_until_ready(logits)
    assert logits.shape == (B, T, VOCAB_SIZE) and logits.dtype == jnp.float32
    assert loss is None

    ref = gpt_reference(tokens, params)
    max_err = float(jnp.max(jnp.abs(logits - ref)))
    assert jnp.allclose(logits, ref, atol=2e-3, rtol=2e-3), max_err

    print("KERNEL_OK")
</pallas_src>

<mosaic_0001>
module attributes {stable_mosaic.version = 11 : i64} {
  func.func @gpt_kernel(%arg0: memref<16x64xf32, #tpu.memory_space<vmem>>, %arg1: memref<16x16xf32, #tpu.memory_space<vmem>>, %arg2: memref<2x64x192xbf16, #tpu.memory_space<vmem>>, %arg3: memref<2x64x64xbf16, #tpu.memory_space<vmem>>, %arg4: memref<2x64x256xbf16, #tpu.memory_space<vmem>>, %arg5: memref<2x256x64xbf16, #tpu.memory_space<vmem>>, %arg6: memref<64x128xbf16, #tpu.memory_space<vmem>>, %arg7: memref<14x1x64xf32, #tpu.memory_space<vmem>>, %arg8: memref<2x1x192xf32, #tpu.memory_space<vmem>>, %arg9: memref<2x1x256xf32, #tpu.memory_space<vmem>>, %arg10: memref<1x128xf32, #tpu.memory_space<vmem>>, %arg11: memref<16x128xf32, #tpu.memory_space<vmem>>) attributes {dimension_semantics = [], scalar_prefetch = 0 : i64, scratch_operands = 0 : i64, tpu.core_type = #tpu.core_type<tc>} {
    %c0 = arith.constant 0 : index
    %c0_0 = arith.constant 0 : index
    %0 = vector.load %arg0[%c0, %c0_0] : memref<16x64xf32, #tpu.memory_space<vmem>>, vector<16x64xf32>
    %c0_1 = arith.constant 0 : index
    %c0_2 = arith.constant 0 : index
    %1 = vector.load %arg1[%c0_1, %c0_2] : memref<16x16xf32, #tpu.memory_space<vmem>>, vector<16x16xf32>
    %c0_3 = arith.constant 0 : index
    %c0_4 = arith.constant 0 : index
    %c0_5 = arith.constant 0 : index
    %2 = vector.load %arg7[%c0_3, %c0_4, %c0_5] : memref<14x1x64xf32, #tpu.memory_space<vmem>>, vector<1x1x64xf32>
    %3 = vector.shape_cast %2 : vector<1x1x64xf32> to vector<1x64xf32>
    %c1 = arith.constant 1 : index
    %c0_6 = arith.constant 0 : index
    %c0_7 = arith.constant 0 : index
    %4 = vector.load %arg7[%c1, %c0_6, %c0_7] : memref<14x1x64xf32, #tpu.memory_space<vmem>>, vector<1x1x64xf32>
    %5 = vector.shape_cast %4 : vector<1x1x64xf32> to vector<1x64xf32>
    %cst = arith.constant dense<0.000000e+00> : vector<16xf32>
    %6 = vector.multi_reduction <add>, %0, %cst [1] : vector<16x64xf32> to vector<16xf32>
    %7 = vector.shape_cast %6 : vector<16xf32> to vector<16x1xf32>
    %cst_8 = arith.constant 6.400000e+01 : f32
    %8 = vector.broadcast %cst_8 : f32 to vector<16x1xf32>
    %9 = arith.divf %7, %8 : vector<16x1xf32>
    %10 = vector.broadcast %9 : vector<16x1xf32> to vector<16x64xf32>
    %11 = arith.subf %0, %10 : vector<16x64xf32>
    %12 = vector.broadcast %9 : vector<16x1xf32> to vector<16x64xf32>
    %13 = arith.subf %0, %12 : vector<16x64xf32>
    %14 = arith.mulf %11, %13 : vector<16x64xf32>
    %cst_9 = arith.constant dense<0.000000e+00> : vector<16xf32>
    %15 = vector.multi_reduction <add>, %14, %cst_9 [1] : vector<16x64xf32> to vector<16xf32>
    %16 = vector.shape_cast %15 : vector<16xf32> to vector<16x1xf32>
    %cst_10 = arith.constant 6.400000e+01 : f32
    %17 = vector.broadcast %cst_10 : f32 to vector<16x1xf32>
    %18 = arith.divf %16, %17 : vector<16x1xf32>
    %19 = vector.broadcast %9 : vector<16x1xf32> to vector<16x64xf32>
    %20 = arith.subf %0, %19 : vector<16x64xf32>
    %cst_11 = arith.constant 9.99999974E-6 : f32
    %21 = vector.broadcast %cst_11 : f32 to vector<16x1xf32>
    %22 = arith.addf %18, %21 : vector<16x1xf32>
    %23 = math.rsqrt %22 : vector<16x1xf32>
    %24 = vector.broadcast %23 : vector<16x1xf32> to vector<16x64xf32>
    %25 = arith.mulf %20, %24 : vector<16x64xf32>
    %26 = vector.broadcast %3 : vector<1x64xf32> to vector<16x64xf32>
    %27 = arith.mulf %25, %26 : vector<16x64xf32>
    %28 = vector.broadcast %5 : vector<1x64xf32> to vector<16x64xf32>
    %29 = arith.addf %27, %28 : vector<16x64xf32>
    %c0_12 = arith.constant 0 : index
    %c0_13 = arith.constant 0 : index
    %c0_14 = arith.constant 0 : index
    %30 = vector.load %arg2[%c0_12, %c0_13, %c0_14] : memref<2x64x192xbf16, #tpu.memory_space<vmem>>, vector<1x64x192xbf16>
    %31 = vector.shape_cast %30 : vector<1x64x192xbf16> to vector<64x192xbf16>
    %32 = arith.truncf %29 : vector<16x64xf32> to vector<16x64xbf16>
    %cst_15 = arith.constant dense<0.000000e+00> : vector<16x192xf32>
    %33 = tpu.matmul %32, %31, %cst_15 {dimension_numbers = #tpu.dot_dimension_numbers<[1], [0], [0], [1], [0, 0, 1, 1], [], []>} : vector<16x64xbf16>, vector<64x192xbf16>, vector<16x192xf32> -> vector<16x192xf32>
    %c0_16 = arith.constant 0 : index
    %c0_17 = arith.constant 0 : index
    %c0_18 = arith.constant 0 : index
    %34 = vector.load %arg8[%c0_16, %c0_17, %c0_18] : memref<2x1x192xf32, #tpu.memory_space<vmem>>, vector<1x1x192xf32>
    %35 = vector.shape_cast %34 : vector<1x1x192xf32> to vector<1x192xf32>
    %36 = vector.broadcast %35 : vector<1x192xf32> to vector<16x192xf32>
    %37 = arith.addf %33, %36 : vector<16x192xf32>
    %38 = vector.extract_strided_slice %37 {offsets = [0, 0], sizes = [16, 16], strides = [1, 1]} : vector<16x192xf32> to vector<16x16xf32>
    %39 = vector.extract_strided_slice %37 {offsets = [0, 64], sizes = [16, 16], strides = [1, 1]} : vector<16x192xf32> to vector<16x16xf32>
    %40 = vector.extract_strided_slice %37 {offsets = [0, 128], sizes = [16, 16], strides = [1, 1]} : vector<16x192xf32> to vector<16x16xf32>
    %cst_19 = arith.constant dense<0.000000e+00> : vector<16x16xf32>
    %41 = tpu.matmul %38, %39, %cst_19 {dimension_numbers = #tpu.dot_dimension_numbers<[1], [1], [0], [0], [0, 0, 1, 0], [], []>} : vector<16x16xf32>, vector<16x16xf32>, vector<16x16xf32> -> vector<16x16xf32>
    %42 = arith.addf %41, %1 : vector<16x16xf32>
    %cst_20 = arith.constant dense<0xFF800000> : vector<16xf32>
    %43 = vector.multi_reduction <maximumf>, %42, %cst_20 [1] : vector<16x16xf32> to vector<16xf32>
    %44 = vector.shape_cast %43 : vector<16xf32> to vector<16x1xf32>
    %45 = vector.broadcast %44 : vector<16x1xf32> to vector<16x16xf32>
    %46 = arith.subf %42, %45 : vector<16x16xf32>
    %47 = math.exp %46 : vector<16x16xf32>
    %cst_21 = arith.constant dense<0.000000e+00> : vector<16xf32>
    %48 = vector.multi_reduction <add>, %47, %cst_21 [1] : vector<16x16xf32> to vector<16xf32>
    %49 = vector.shape_cast %48 : vector<16xf32> to vector<16x1xf32>
    %50 = tpu.reciprocal %49 {approx = true} : vector<16x1xf32> -> vector<16x1xf32>
    %51 = vector.broadcast %50 : vector<16x1xf32> to vector<16x16xf32>
    %52 = arith.mulf %47, %51 : vector<16x16xf32>
    %cst_22 = arith.constant dense<0.000000e+00> : vector<16x16xf32>
    %53 = tpu.matmul %52, %40, %cst_22 {dimension_numbers = #tpu.dot_dimension_numbers<[1], [0], [0], [1], [0, 0, 1, 1], [], []>} : vector<16x16xf32>, vector<16x16xf32>, vector<16x16xf32> -> vector<16x16xf32>
    %54 = vector.extract_strided_slice %37 {offsets = [0, 16], sizes = [16, 16], strides = [1, 1]} : vector<16x192xf32> to vector<16x16xf32>
    %55 = vector.extract_strided_slice %37 {offsets = [0, 80], sizes = [16, 16], strides = [1, 1]} : vector<16x192xf32> to vector<16x16xf32>
    %56 = vector.extract_strided_slice %37 {offsets = [0, 144], sizes = [16, 16], strides = [1, 1]} : vector<16x192xf32> to vector<16x16xf32>
    %cst_23 = arith.constant dense<0.000000e+00> : vector<16x16xf32>
    %57 = tpu.matmul %54, %55, %cst_23 {dimension_numbers = #tpu.dot_dimension_numbers<[1], [1], [0], [0], [0, 0, 1, 0], [], []>} : vector<16x16xf32>, vector<16x16xf32>, vector<16x16xf32> -> vector<16x16xf32>
    %58 = arith.addf %57, %1 : vector<16x16xf32>
    %cst_24 = arith.constant dense<0xFF800000> : vector<16xf32>
    %59 = vector.multi_reduction <maximumf>, %58, %cst_24 [1] : vector<16x16xf32> to vector<16xf32>
    %60 = vector.shape_cast %59 : vector<16xf32> to vector<16x1xf32>
    %61 = vector.broadcast %60 : vector<16x1xf32> to vector<16x16xf32>
    %62 = arith.subf %58, %61 : vector<16x16xf32>
    %63 = math.exp %62 : vector<16x16xf32>
    %cst_25 = arith.constant dense<0.000000e+00> : vector<16xf32>
    %64 = vector.multi_reduction <add>, %63, %cst_25 [1] : vector<16x16xf32> to vector<16xf32>
    %65 = vector.shape_cast %64 : vector<16xf32> to vector<16x1xf32>
    %66 = tpu.reciprocal %65 {approx = true} : vector<16x1xf32> -> vector<16x1xf32>
    %67 = vector.broadcast %66 : vector<16x1xf32> to vector<16x16xf32>
    %68 = arith.mulf %63, %67 : vector<16x16xf32>
    %cst_26 = arith.constant dense<0.000000e+00> : vector<16x16xf32>
    %69 = tpu.matmul %68, %56, %cst_26 {dimension_numbers = #tpu.dot_dimension_numbers<[1], [0], [0], [1], [0, 0, 1, 1], [], []>} : vector<16x16xf32>, vector<16x16xf32>, vector<16x16xf32> -> vector<16x16xf32>
    %70 = vector.extract_strided_slice %37 {offsets = [0, 32], sizes = [16, 16], strides = [1, 1]} : vector<16x192xf32> to vector<16x16xf32>
    %71 = vector.extract_strided_slice %37 {offsets = [0, 96], sizes = [16, 16], strides = [1, 1]} : vector<16x192xf32> to vector<16x16xf32>
    %72 = vector.extract_strided_slice %37 {offsets = [0, 160], sizes = [16, 16], strides = [1, 1]} : vector<16x192xf32> to vector<16x16xf32>
    %cst_27 = arith.constant dense<0.000000e+00> : vector<16x16xf32>
    %73 = tpu.matmul %70, %71, %cst_27 {dimension_numbers = #tpu.dot_dimension_numbers<[1], [1], [0], [0], [0, 0, 1, 0], [], []>} : vector<16x16xf32>, vector<16x16xf32>, vector<16x16xf32> -> vector<16x16xf32>
    %74 = arith.addf %73, %1 : vector<16x16xf32>
    %cst_28 = arith.constant dense<0xFF800000> : vector<16xf32>
    %75 = vector.multi_reduction <maximumf>, %74, %cst_28 [1] : vector<16x16xf32> to vector<16xf32>
    %76 = vector.shape_cast %75 : vector<16xf32> to vector<16x1xf32>
    %77 = vector.broadcast %76 : vector<16x1xf32> to vector<16x16xf32>
    %78 = arith.subf %74, %77 : vector<16x16xf32>
    %79 = math.exp %78 : vector<16x16xf32>
    %cst_29 = arith.constant dense<0.000000e+00> : vector<16xf32>
    %80 = vector.multi_reduction <add>, %79, %cst_29 [1] : vector<16x16xf32> to vector<16xf32>
    %81 = vector.shape_cast %80 : vector<16xf32> to vector<16x1xf32>
    %82 = tpu.reciprocal %81 {approx = true} : vector<16x1xf32> -> vector<16x1xf32>
    %83 = vector.broadcast %82 : vector<16x1xf32> to vector<16x16xf32>
    %84 = arith.mulf %79, %83 : vector<16x16xf32>
    %cst_30 = arith.constant dense<0.000000e+00> : vector<16x16xf32>
    %85 = tpu.matmul %84, %72, %cst_30 {dimension_numbers = #tpu.dot_dimension_numbers<[1], [0], [0], [1], [0, 0, 1, 1], [], []>} : vector<16x16xf32>, vector<16x16xf32>, vector<16x16xf32> -> vector<16x16xf32>
    %86 = vector.extract_strided_slice %37 {offsets = [0, 48], sizes = [16, 16], strides = [1, 1]} : vector<16x192xf32> to vector<16x16xf32>
    %87 = vector.extract_strided_slice %37 {offsets = [0, 112], sizes = [16, 16], strides = [1, 1]} : vector<16x192xf32> to vector<16x16xf32>
    %88 = vector.extract_strided_slice %37 {offsets = [0, 176], sizes = [16, 16], strides = [1, 1]} : vector<16x192xf32> to vector<16x16xf32>
    %cst_31 = arith.constant dense<0.000000e+00> : vector<16x16xf32>
    %89 = tpu.matmul %86, %87, %cst_31 {dimension_numbers = #tpu.dot_dimension_numbers<[1], [1], [0], [0], [0, 0, 1, 0], [], []>} : vector<16x16xf32>, vector<16x16xf32>, vector<16x16xf32> -> vector<16x16xf32>
    %90 = arith.addf %89, %1 : vector<16x16xf32>
    %cst_32 = arith.constant dense<0xFF800000> : vector<16xf32>
    %91 = vector.multi_reduction <maximumf>, %90, %cst_32 [1] : vector<16x16xf32> to vector<16xf32>
    %92 = vector.shape_cast %91 : vector<16xf32> to vector<16x1xf32>
    %93 = vector.broadcast %92 : vector<16x1xf32> to vector<16x16xf32>
    %94 = arith.subf %90, %93 : vector<16x16xf32>
    %95 = math.exp %94 : vector<16x16xf32>
    %cst_33 = arith.constant dense<0.000000e+00> : vector<16xf32>
    %96 = vector.multi_reduction <add>, %95, %cst_33 [1] : vector<16x16xf32> to vector<16xf32>
    %97 = vector.shape_cast %96 : vector<16xf32> to vector<16x1xf32>
    %98 = tpu.reciprocal %97 {approx = true} : vector<16x1xf32> -> vector<16x1xf32>
    %99 = vector.broadcast %98 : vector<16x1xf32> to vector<16x16xf32>
    %100 = arith.mulf %95, %99 : vector<16x16xf32>
    %cst_34 = arith.constant dense<0.000000e+00> : vector<16x16xf32>
    %101 = tpu.matmul %100, %88, %cst_34 {dimension_numbers = #tpu.dot_dimension_numbers<[1], [0], [0], [1], [0, 0, 1, 1], [], []>} : vector<16x16xf32>, vector<16x16xf32>, vector<16x16xf32> -> vector<16x16xf32>
    %102 = tpu.concatenate %53, %69, %85, %101 in 1 : vector<16x16xf32>, vector<16x16xf32>, vector<16x16xf32>, vector<16x16xf32> -> vector<16x64xf32>
    %c0_35 = arith.constant 0 : index
    %c0_36 = arith.constant 0 : index
    %c0_37 = arith.constant 0 : index
    %103 = vector.load %arg3[%c0_35, %c0_36, %c0_37] : memref<2x64x64xbf16, #tpu.memory_space<vmem>>, vector<1x64x64xbf16>
    %104 = vector.shape_cast %103 : vector<1x64x64xbf16> to vector<64x64xbf16>
    %105 = arith.truncf %102 : vector<16x64xf32> to vector<16x64xbf16>
    %cst_38 = arith.constant dense<0.000000e+00> : vector<16x64xf32>
    %106 = tpu.matmul %105, %104, %cst_38 {dimension_numbers = #tpu.dot_dimension_numbers<[1], [0], [0], [1], [0, 0, 1, 1], [], []>} : vector<16x64xbf16>, vector<64x64xbf16>, vector<16x64xf32> -> vector<16x64xf32>
    %107 = arith.addf %0, %106 : vector<16x64xf32>
    %c2 = arith.constant 2 : index
    %c0_39 = arith.constant 0 : index
    %c0_40 = arith.constant 0 : index
    %108 = vector.load %arg7[%c2, %c0_39, %c0_40] : memref<14x1x64xf32, #tpu.memory_space<vmem>>, vector<1x1x64xf32>
    %109 = vector.shape_cast %108 : vector<1x1x64xf32> to vector<1x64xf32>
    %110 = vector.broadcast %109 : vector<1x64xf32> to vector<16x64xf32>
    %111 = arith.addf %107, %110 : vector<16x64xf32>
    %c3 = arith.constant 3 : index
    %c0_41 = arith.constant 0 : index
    %c0_42 = arith.constant 0 : index
    %112 = vector.load %arg7[%c3, %c0_41, %c0_42] : memref<14x1x64xf32, #tpu.memory_space<vmem>>, vector<1x1x64xf32>
    %113 = vector.shape_cast %112 : vector<1x1x64xf32> to vector<1x64xf32>
    %c4 = arith.constant 4 : index
    %c0_43 = arith.constant 0 : index
    %c0_44 = arith.constant 0 : index
    %114 = vector.load %arg7[%c4, %c0_43, %c0_44] : memref<14x1x64xf32, #tpu.memory_space<vmem>>, vector<1x1x64xf32>
    %115 = vector.shape_cast %114 : vector<1x1x64xf32> to vector<1x64xf32>
    %cst_45 = arith.constant dense<0.000000e+00> : vector<16xf32>
    %116 = vector.multi_reduction <add>, %111, %cst_45 [1] : vector<16x64xf32> to vector<16xf32>
    %117 = vector.shape_cast %116 : vector<16xf32> to vector<16x1xf32>
    %cst_46 = arith.constant 6.400000e+01 : f32
    %118 = vector.broadcast %cst_46 : f32 to vector<16x1xf32>
    %119 = arith.divf %117, %118 : vector<16x1xf32>
    %120 = vector.broadcast %119 : vector<16x1xf32> to vector<16x64xf32>
    %121 = arith.subf %111, %120 : vector<16x64xf32>
    %122 = vector.broadcast %119 : vector<16x1xf32> to vector<16x64xf32>
    %123 = arith.subf %111, %122 : vector<16x64xf32>
    %124 = arith.mulf %121, %123 : vector<16x64xf32>
    %cst_47 = arith.constant dense<0.000000e+00> : vector<16xf32>
    %125 = vector.multi_reduction <add>, %124, %cst_47 [1] : vector<16x64xf32> to vector<16xf32>
    %126 = vector.shape_cast %125 : vector<16xf32> to vector<16x1xf32>
    %cst_48 = arith.constant 6.400000e+01 : f32
    %127 = vector.broadcast %cst_48 : f32 to vector<16x1xf32>
    %128 = arith.divf %126, %127 : vector<16x1xf32>
    %129 = vector.broadcast %119 : vector<16x1xf32> to vector<16x64xf32>
    %130 = arith.subf %111, %129 : vector<16x64xf32>
    %cst_49 = arith.constant 9.99999974E-6 : f32
    %131 = vector.broadcast %cst_49 : f32 to vector<16x1xf32>
    %132 = arith.addf %128, %131 : vector<16x1xf32>
    %133 = math.rsqrt %132 : vector<16x1xf32>
    %134 = vector.broadcast %133 : vector<16x1xf32> to vector<16x64xf32>
    %135 = arith.mulf %130, %134 : vector<16x64xf32>
    %136 = vector.broadcast %113 : vector<1x64xf32> to vector<16x64xf32>
    %137 = arith.mulf %135, %136 : vector<16x64xf32>
    %138 = vector.broadcast %115 : vector<1x64xf32> to vector<16x64xf32>
    %139 = arith.addf %137, %138 : vector<16x64xf32>
    %c0_50 = arith.constant 0 : index
    %c0_51 = arith.constant 0 : index
    %c0_52 = arith.constant 0 : index
    %140 = vector.load %arg4[%c0_50, %c0_51, %c0_52] : memref<2x64x256xbf16, #tpu.memory_space<vmem>>, vector<1x64x256xbf16>
    %141 = vector.shape_cast %140 : vector<1x64x256xbf16> to vector<64x256xbf16>
    %142 = arith.truncf %139 : vector<16x64xf32> to vector<16x64xbf16>
    %cst_53 = arith.constant dense<0.000000e+00> : vector<16x256xf32>
    %143 = tpu.matmul %142, %141, %cst_53 {dimension_numbers = #tpu.dot_dimension_numbers<[1], [0], [0], [1], [0, 0, 1, 1], [], []>} : vector<16x64xbf16>, vector<64x256xbf16>, vector<16x256xf32> -> vector<16x256xf32>
    %c0_54 = arith.constant 0 : index
    %c0_55 = arith.constant 0 : index
    %c0_56 = arith.constant 0 : index
    %144 = vector.load %arg9[%c0_54, %c0_55, %c0_56] : memref<2x1x256xf32, #tpu.memory_space<vmem>>, vector<1x1x256xf32>
    %145 = vector.shape_cast %144 : vector<1x1x256xf32> to vector<1x256xf32>
    %146 = vector.broadcast %145 : vector<1x256xf32> to vector<16x256xf32>
    %147 = arith.addf %143, %146 : vector<16x256xf32>
    %cst_57 = arith.constant 5.000000e-01 : f32
    %148 = vector.broadcast %cst_57 : f32 to vector<16x256xf32>
    %149 = arith.mulf %148, %147 : vector<16x256xf32>
    %cst_58 = arith.constant 0.707106769 : f32
    %150 = vector.broadcast %cst_58 : f32 to vector<16x256xf32>
    %151 = arith.mulf %147, %150 : vector<16x256xf32>
    %152 = math.absf %151 : vector<16x256xf32>
    %cst_59 = arith.constant 0.327591091 : f32
    %153 = vector.broadcast %cst_59 : f32 to vector<16x256xf32>
    %154 = arith.mulf %153, %152 : vector<16x256xf32>
    %cst_60 = arith.constant 1.000000e+00 : f32
    %155 = vector.broadcast %cst_60 : f32 to vector<16x256xf32>
    %156 = arith.addf %155, %154 : vector<16x256xf32>
    %cst_61 = arith.constant 1.000000e+00 : f32
    %157 = vector.broadcast %cst_61 : f32 to vector<16x256xf32>
    %158 = arith.divf %157, %156 : vector<16x256xf32>
    %cst_62 = arith.constant 1.06140542 : f32
    %159 = vector.broadcast %cst_62 : f32 to vector<16x256xf32>
    %160 = arith.mulf %159, %158 : vector<16x256xf32>
    %cst_63 = arith.constant 1.45315206 : f32
    %161 = vector.broadcast %cst_63 : f32 to vector<16x256xf32>
    %162 = arith.subf %160, %161 : vector<16x256xf32>
    %163 = arith.mulf %162, %158 : vector<16x256xf32>
    %cst_64 = arith.constant 1.42141378 : f32
    %164 = vector.broadcast %cst_64 : f32 to vector<16x256xf32>
    %165 = arith.addf %163, %164 : vector<16x256xf32>
    %166 = arith.mulf %165, %158 : vector<16x256xf32>
    %cst_65 = arith.constant 0.284496725 : f32
    %167 = vector.broadcast %cst_65 : f32 to vector<16x256xf32>
    %168 = arith.subf %166, %167 : vector<16x256xf32>
    %169 = arith.mulf %168, %158 : vector<16x256xf32>
    %cst_66 = arith.constant 0.254829586 : f32
    %170 = vector.broadcast %cst_66 : f32 to vector<16x256xf32>
    %171 = arith.addf %169, %170 : vector<16x256xf32>
    %172 = arith.mulf %171, %158 : vector<16x256xf32>
    %cst_67 = arith.constant 0.000000e+00 : f32
    %173 = vector.broadcast %cst_67 : f32 to vector<16x256xf32>
    %174 = arith.subf %173, %152 : vector<16x256xf32>
    %175 = arith.mulf %174, %152 : vector<16x256xf32>
    %176 = math.exp %175 : vector<16x256xf32>
    %177 = arith.mulf %172, %176 : vector<16x256xf32>
    %cst_68 = arith.constant 1.000000e+00 : f32
    %178 = vector.broadcast %cst_68 : f32 to vector<16x256xf32>
    %179 = arith.subf %178, %177 : vector<16x256xf32>
    %cst_69 = arith.constant 0.000000e+00 : f32
    %180 = vector.broadcast %cst_69 : f32 to vector<16x256xf32>
    %181 = arith.cmpf olt, %151, %180 : vector<16x256xf32>
    %cst_70 = arith.constant 0.000000e+00 : f32
    %182 = vector.broadcast %cst_70 : f32 to vector<16x256xf32>
    %183 = arith.subf %182, %179 : vector<16x256xf32>
    %184 = arith.select %181, %183, %179 : vector<16x256xi1>, vector<16x256xf32>
    %cst_71 = arith.constant 1.000000e+00 : f32
    %185 = vector.broadcast %cst_71 : f32 to vector<16x256xf32>
    %186 = arith.addf %185, %184 : vector<16x256xf32>
    %187 = arith.mulf %149, %186 : vector<16x256xf32>
    %c0_72 = arith.constant 0 : index
    %c0_73 = arith.constant 0 : index
    %c0_74 = arith.constant 0 : index
    %188 = vector.load %arg5[%c0_72, %c0_73, %c0_74] : memref<2x256x64xbf16, #tpu.memory_space<vmem>>, vector<1x256x64xbf16>
    %189 = vector.shape_cast %188 : vector<1x256x64xbf16> to vector<256x64xbf16>
    %190 = arith.truncf %187 : vector<16x256xf32> to vector<16x256xbf16>
    %cst_75 = arith.constant dense<0.000000e+00> : vector<16x64xf32>
    %191 = tpu.matmul %190, %189, %cst_75 {dimension_numbers = #tpu.dot_dimension_numbers<[1], [0], [0], [1], [0, 0, 1, 1], [], []>} : vector<16x256xbf16>, vector<256x64xbf16>, vector<16x64xf32> -> vector<16x64xf32>
    %192 = arith.addf %111, %191 : vector<16x64xf32>
    %c5 = arith.constant 5 : index
    %c0_76 = arith.constant 0 : index
    %c0_77 = arith.constant 0 : index
    %193 = vector.load %arg7[%c5, %c0_76, %c0_77] : memref<14x1x64xf32, #tpu.memory_space<vmem>>, vector<1x1x64xf32>
    %194 = vector.shape_cast %193 : vector<1x1x64xf32> to vector<1x64xf32>
    %195 = vector.broadcast %194 : vector<1x64xf32> to vector<16x64xf32>
    %196 = arith.addf %192, %195 : vector<16x64xf32>
    %c6 = arith.constant 6 : index
    %c0_78 = arith.constant 0 : index
    %c0_79 = arith.constant 0 : index
    %197 = vector.load %arg7[%c6, %c0_78, %c0_79] : memref<14x1x64xf32, #tpu.memory_space<vmem>>, vector<1x1x64xf32>
    %198 = vector.shape_cast %197 : vector<1x1x64xf32> to vector<1x64xf32>
    %c7 = arith.constant 7 : index
    %c0_80 = arith.constant 0 : index
    %c0_81 = arith.constant 0 : index
    %199 = vector.load %arg7[%c7, %c0_80, %c0_81] : memref<14x1x64xf32, #tpu.memory_space<vmem>>, vector<1x1x64xf32>
    %200 = vector.shape_cast %199 : vector<1x1x64xf32> to vector<1x64xf32>
    %cst_82 = arith.constant dense<0.000000e+00> : vector<16xf32>
    %201 = vector.multi_reduction <add>, %196, %cst_82 [1] : vector<16x64xf32> to vector<16xf32>
    %202 = vector.shape_cast %201 : vector<16xf32> to vector<16x1xf32>
    %cst_83 = arith.constant 6.400000e+01 : f32
    %203 = vector.broadcast %cst_83 : f32 to vector<16x1xf32>
    %204 = arith.divf %202, %203 : vector<16x1xf32>
    %205 = vector.broadcast %204 : vector<16x1xf32> to vector<16x64xf32>
    %206 = arith.subf %196, %205 : vector<16x64xf32>
    %207 = vector.broadcast %204 : vector<16x1xf32> to vector<16x64xf32>
    %208 = arith.subf %196, %207 : vector<16x64xf32>
    %209 = arith.mulf %206, %208 : vector<16x64xf32>
    %cst_84 = arith.constant dense<0.000000e+00> : vector<16xf32>
    %210 = vector.multi_reduction <add>, %209, %cst_84 [1] : vector<16x64xf32> to vector<16xf32>
    %211 = vector.shape_cast %210 : vector<16xf32> to vector<16x1xf32>
    %cst_85 = arith.constant 6.400000e+01 : f32
    %212 = vector.broadcast %cst_85 : f32 to vector<16x1xf32>
    %213 = arith.divf %211, %212 : vector<16x1xf32>
    %214 = vector.broadcast %204 : vector<16x1xf32> to vector<16x64xf32>
    %215 = arith.subf %196, %214 : vector<16x64xf32>
    %cst_86 = arith.constant 9.99999974E-6 : f32
    %216 = vector.broadcast %cst_86 : f32 to vector<16x1xf32>
    %217 = arith.addf %213, %216 : vector<16x1xf32>
    %218 = math.rsqrt %217 : vector<16x1xf32>
    %219 = vector.broadcast %218 : vector<16x1xf32> to vector<16x64xf32>
    %220 = arith.mulf %215, %219 : vector<16x64xf32>
    %221 = vector.broadcast %198 : vector<1x64xf32> to vector<16x64xf32>
    %222 = arith.mulf %220, %221 : vector<16x64xf32>
    %223 = vector.broadcast %200 : vector<1x64xf32> to vector<16x64xf32>
    %224 = arith.addf %222, %223 : vector<16x64xf32>
    %c1_87 = arith.constant 1 : index
    %c0_88 = arith.constant 0 : index
    %c0_89 = arith.constant 0 : index
    %225 = vector.load %arg2[%c1_87, %c0_88, %c0_89] : memref<2x64x192xbf16, #tpu.memory_space<vmem>>, vector<1x64x192xbf16>
    %226 = vector.shape_cast %225 : vector<1x64x192xbf16> to vector<64x192xbf16>
    %227 = arith.truncf %224 : vector<16x64xf32> to vector<16x64xbf16>
    %cst_90 = arith.constant dense<0.000000e+00> : vector<16x192xf32>
    %228 = tpu.matmul %227, %226, %cst_90 {dimension_numbers = #tpu.dot_dimension_numbers<[1], [0], [0], [1], [0, 0, 1, 1], [], []>} : vector<16x64xbf16>, vector<64x192xbf16>, vector<16x192xf32> -> vector<16x192xf32>
    %c1_91 = arith.constant 1 : index
    %c0_92 = arith.constant 0 : index
    %c0_93 = arith.constant 0 : index
    %229 = vector.load %arg8[%c1_91, %c0_92, %c0_93] : memref<2x1x192xf32, #tpu.memory_space<vmem>>, vector<1x1x192xf32>
    %230 = vector.shape_cast %229 : vector<1x1x192xf32> to vector<1x192xf32>
    %231 = vector.broadcast %230 : vector<1x192xf32> to vector<16x192xf32>
    %232 = arith.addf %228, %231 : vector<16x192xf32>
    %233 = vector.extract_strided_slice %232 {offsets = [0, 0], sizes = [16, 16], strides = [1, 1]} : vector<16x192xf32> to vector<16x16xf32>
    %234 = vector.extract_strided_slice %232 {offsets = [0, 64], sizes = [16, 16], strides = [1, 1]} : vector<16x192xf32> to vector<16x16xf32>
    %235 = vector.extract_strided_slice %232 {offsets = [0, 128], sizes = [16, 16], strides = [1, 1]} : vector<16x192xf32> to vector<16x16xf32>
    %cst_94 = arith.constant dense<0.000000e+00> : vector<16x16xf32>
    %236 = tpu.matmul %233, %234, %cst_94 {dimension_numbers = #tpu.dot_dimension_numbers<[1], [1], [0], [0], [0, 0, 1, 0], [], []>} : vector<16x16xf32>, vector<16x16xf32>, vector<16x16xf32> -> vector<16x16xf32>
    %237 = arith.addf %236, %1 : vector<16x16xf32>
    %cst_95 = arith.constant dense<0xFF800000> : vector<16xf32>
    %238 = vector.multi_reduction <maximumf>, %237, %cst_95 [1] : vector<16x16xf32> to vector<16xf32>
    %239 = vector.shape_cast %238 : vector<16xf32> to vector<16x1xf32>
    %240 = vector.broadcast %239 : vector<16x1xf32> to vector<16x16xf32>
    %241 = arith.subf %237, %240 : vector<16x16xf32>
    %242 = math.exp %241 : vector<16x16xf32>
    %cst_96 = arith.constant dense<0.000000e+00> : vector<16xf32>
    %243 = vector.multi_reduction <add>, %242, %cst_96 [1] : vector<16x16xf32> to vector<16xf32>
    %244 = vector.shape_cast %243 : vector<16xf32> to vector<16x1xf32>
    %245 = tpu.reciprocal %244 {approx = true} : vector<16x1xf32> -> vector<16x1xf32>
    %246 = vector.broadcast %245 : vector<16x1xf32> to vector<16x16xf32>
    %247 = arith.mulf %242, %246 : vector<16x16xf32>
    %cst_97 = arith.constant dense<0.000000e+00> : vector<16x16xf32>
    %248 = tpu.matmul %247, %235, %cst_97 {dimension_numbers = #tpu.dot_dimension_numbers<[1], [0], [0], [1], [0, 0, 1, 1], [], []>} : vector<16x16xf32>, vector<16x16xf32>, vector<16x16xf32> -> vector<16x16xf32>
    %249 = vector.extract_strided_slice %232 {offsets = [0, 16], sizes = [16, 16], strides = [1, 1]} : vector<16x192xf32> to vector<16x16xf32>
    %250 = vector.extract_strided_slice %232 {offsets = [0, 80], sizes = [16, 16], strides = [1, 1]} : vector<16x192xf32> to vector<16x16xf32>
    %251 = vector.extract_strided_slice %232 {offsets = [0, 144], sizes = [16, 16], strides = [1, 1]} : vector<16x192xf32> to vector<16x16xf32>
    %cst_98 = arith.constant dense<0.000000e+00> : vector<16x16xf32>
    %252 = tpu.matmul %249, %250, %cst_98 {dimension_numbers = #tpu.dot_dimension_numbers<[1], [1], [0], [0], [0, 0, 1, 0], [], []>} : vector<16x16xf32>, vector<16x16xf32>, vector<16x16xf32> -> vector<16x16xf32>
    %253 = arith.addf %252, %1 : vector<16x16xf32>
    %cst_99 = arith.constant dense<0xFF800000> : vector<16xf32>
    %254 = vector.multi_reduction <maximumf>, %253, %cst_99 [1] : vector<16x16xf32> to vector<16xf32>
    %255 = vector.shape_cast %254 : vector<16xf32> to vector<16x1xf32>
    %256 = vector.broadcast %255 : vector<16x1xf32> to vector<16x16xf32>
    %257 = arith.subf %253, %256 : vector<16x16xf32>
    %258 = math.exp %257 : vector<16x16xf32>
    %cst_100 = arith.constant dense<0.000000e+00> : vector<16xf32>
    %259 = vector.multi_reduction <add>, %258, %cst_100 [1] : vector<16x16xf32> to vector<16xf32>
    %260 = vector.shape_cast %259 : vector<16xf32> to vector<16x1xf32>
    %261 = tpu.reciprocal %260 {approx = true} : vector<16x1xf32> -> vector<16x1xf32>
    %262 = vector.broadcast %261 : vector<16x1xf32> to vector<16x16xf32>
    %263 = arith.mulf %258, %262 : vector<16x16xf32>
    %cst_101 = arith.constant dense<0.000000e+00> : vector<16x16xf32>
    %264 = tpu.matmul %263, %251, %cst_101 {dimension_numbers = #tpu.dot_dimension_numbers<[1], [0], [0], [1], [0, 0, 1, 1], [], []>} : vector<16x16xf32>, vector<16x16xf32>, vector<16x16xf32> -> vector<16x16xf32>
    %265 = vector.extract_strided_slice %232 {offsets = [0, 32], sizes = [16, 16], strides = [1, 1]} : vector<16x192xf32> to vector<16x16xf32>
    %266 = vector.extract_strided_slice %232 {offsets = [0, 96], sizes = [16, 16], strides = [1, 1]} : vector<16x192xf32> to vector<16x16xf32>
    %267 = vector.extract_strided_slice %232 {offsets = [0, 160], sizes = [16, 16], strides = [1, 1]} : vector<16x192xf32> to vector<16x16xf32>
    %cst_102 = arith.constant dense<0.000000e+00> : vector<16x16xf32>
    %268 = tpu.matmul %265, %266, %cst_102 {dimension_numbers = #tpu.dot_dimension_numbers<[1], [1], [0], [0], [0, 0, 1, 0], [], []>} : vector<16x16xf32>, vector<16x16xf32>, vector<16x16xf32> -> vector<16x16xf32>
    %269 = arith.addf %268, %1 : vector<16x16xf32>
    %cst_103 = arith.constant dense<0xFF800000> : vector<16xf32>
    %270 = vector.multi_reduction <maximumf>, %269, %cst_103 [1] : vector<16x16xf32> to vector<16xf32>
    %271 = vector.shape_cast %270 : vector<16xf32> to vector<16x1xf32>
    %272 = vector.broadcast %271 : vector<16x1xf32> to vector<16x16xf32>
    %273 = arith.subf %269, %272 : vector<16x16xf32>
    %274 = math.exp %273 : vector<16x16xf32>
    %cst_104 = arith.constant dense<0.000000e+00> : vector<16xf32>
    %275 = vector.multi_reduction <add>, %274, %cst_104 [1] : vector<16x16xf32> to vector<16xf32>
    %276 = vector.shape_cast %275 : vector<16xf32> to vector<16x1xf32>
    %277 = tpu.reciprocal %276 {approx = true} : vector<16x1xf32> -> vector<16x1xf32>
    %278 = vector.broadcast %277 : vector<16x1xf32> to vector<16x16xf32>
    %279 = arith.mulf %274, %278 : vector<16x16xf32>
    %cst_105 = arith.constant dense<0.000000e+00> : vector<16x16xf32>
    %280 = tpu.matmul %279, %267, %cst_105 {dimension_numbers = #tpu.dot_dimension_numbers<[1], [0], [0], [1], [0, 0, 1, 1], [], []>} : vector<16x16xf32>, vector<16x16xf32>, vector<16x16xf32> -> vector<16x16xf32>
    %281 = vector.extract_strided_slice %232 {offsets = [0, 48], sizes = [16, 16], strides = [1, 1]} : vector<16x192xf32> to vector<16x16xf32>
    %282 = vector.extract_strided_slice %232 {offsets = [0, 112], sizes = [16, 16], strides = [1, 1]} : vector<16x192xf32> to vector<16x16xf32>
    %283 = vector.extract_strided_slice %232 {offsets = [0, 176], sizes = [16, 16], strides = [1, 1]} : vector<16x192xf32> to vector<16x16xf32>
    %cst_106 = arith.constant dense<0.000000e+00> : vector<16x16xf32>
    %284 = tpu.matmul %281, %282, %cst_106 {dimension_numbers = #tpu.dot_dimension_numbers<[1], [1], [0], [0], [0, 0, 1, 0], [], []>} : vector<16x16xf32>, vector<16x16xf32>, vector<16x16xf32> -> vector<16x16xf32>
    %285 = arith.addf %284, %1 : vector<16x16xf32>
    %cst_107 = arith.constant dense<0xFF800000> : vector<16xf32>
    %286 = vector.multi_reduction <maximumf>, %285, %cst_107 [1] : vector<16x16xf32> to vector<16xf32>
    %287 = vector.shape_cast %286 : vector<16xf32> to vector<16x1xf32>
    %288 = vector.broadcast %287 : vector<16x1xf32> to vector<16x16xf32>
    %289 = arith.subf %285, %288 : vector<16x16xf32>
    %290 = math.exp %289 : vector<16x16xf32>
    %cst_108 = arith.constant dense<0.000000e+00> : vector<16xf32>
    %291 = vector.multi_reduction <add>, %290, %cst_108 [1] : vector<16x16xf32> to vector<16xf32>
    %292 = vector.shape_cast %291 : vector<16xf32> to vector<16x1xf32>
    %293 = tpu.reciprocal %292 {approx = true} : vector<16x1xf32> -> vector<16x1xf32>
    %294 = vector.broadcast %293 : vector<16x1xf32> to vector<16x16xf32>
    %295 = arith.mulf %290, %294 : vector<16x16xf32>
    %cst_109 = arith.constant dense<0.000000e+00> : vector<16x16xf32>
    %296 = tpu.matmul %295, %283, %cst_109 {dimension_numbers = #tpu.dot_dimension_numbers<[1], [0], [0], [1], [0, 0, 1, 1], [], []>} : vector<16x16xf32>, vector<16x16xf32>, vector<16x16xf32> -> vector<16x16xf32>
    %297 = tpu.concatenate %248, %264, %280, %296 in 1 : vector<16x16xf32>, vector<16x16xf32>, vector<16x16xf32>, vector<16x16xf32> -> vector<16x64xf32>
    %c1_110 = arith.constant 1 : index
    %c0_111 = arith.constant 0 : index
    %c0_112 = arith.constant 0 : index
    %298 = vector.load %arg3[%c1_110, %c0_111, %c0_112] : memref<2x64x64xbf16, #tpu.memory_space<vmem>>, vector<1x64x64xbf16>
    %299 = vector.shape_cast %298 : vector<1x64x64xbf16> to vector<64x64xbf16>
    %300 = arith.truncf %297 : vector<16x64xf32> to vector<16x64xbf16>
    %cst_113 = arith.constant dense<0.000000e+00> : vector<16x64xf32>
    %301 = tpu.matmul %300, %299, %cst_113 {dimension_numbers = #tpu.dot_dimension_numbers<[1], [0], [0], [1], [0, 0, 1, 1], [], []>} : vector<16x64xbf16>, vector<64x64xbf16>, vector<16x64xf32> -> vector<16x64xf32>
    %302 = arith.addf %196, %301 : vector<16x64xf32>
    %c8 = arith.constant 8 : index
    %c0_114 = arith.constant 0 : index
    %c0_115 = arith.constant 0 : index
    %303 = vector.load %arg7[%c8, %c0_114, %c0_115] : memref<14x1x64xf32, #tpu.memory_space<vmem>>, vector<1x1x64xf32>
    %304 = vector.shape_cast %303 : vector<1x1x64xf32> to vector<1x64xf32>
    %305 = vector.broadcast %304 : vector<1x64xf32> to vector<16x64xf32>
    %306 = arith.addf %302, %305 : vector<16x64xf32>
    %c9 = arith.constant 9 : index
    %c0_116 = arith.constant 0 : index
    %c0_117 = arith.constant 0 : index
    %307 = vector.load %arg7[%c9, %c0_116, %c0_117] : memref<14x1x64xf32, #tpu.memory_space<vmem>>, vector<1x1x64xf32>
    %308 = vector.shape_cast %307 : vector<1x1x64xf32> to vector<1x64xf32>
    %c10 = arith.constant 10 : index
    %c0_118 = arith.constant 0 : index
    %c0_119 = arith.constant 0 : index
    %309 = vector.load %arg7[%c10, %c0_118, %c0_119] : memref<14x1x64xf32, #tpu.memory_space<vmem>>, vector<1x1x64xf32>
    %310 = vector.shape_cast %309 : vector<1x1x64xf32> to vector<1x64xf32>
    %cst_120 = arith.constant dense<0.000000e+00> : vector<16xf32>
    %311 = vector.multi_reduction <add>, %306, %cst_120 [1] : vector<16x64xf32> to vector<16xf32>
    %312 = vector.shape_cast %311 : vector<16xf32> to vector<16x1xf32>
    %cst_121 = arith.constant 6.400000e+01 : f32
    %313 = vector.broadcast %cst_121 : f32 to vector<16x1xf32>
    %314 = arith.divf %312, %313 : vector<16x1xf32>
    %315 = vector.broadcast %314 : vector<16x1xf32> to vector<16x64xf32>
    %316 = arith.subf %306, %315 : vector<16x64xf32>
    %317 = vector.broadcast %314 : vector<16x1xf32> to vector<16x64xf32>
    %318 = arith.subf %306, %317 : vector<16x64xf32>
    %319 = arith.mulf %316, %318 : vector<16x64xf32>
    %cst_122 = arith.constant dense<0.000000e+00> : vector<16xf32>
    %320 = vector.multi_reduction <add>, %319, %cst_122 [1] : vector<16x64xf32> to vector<16xf32>
    %321 = vector.shape_cast %320 : vector<16xf32> to vector<16x1xf32>
    %cst_123 = arith.constant 6.400000e+01 : f32
    %322 = vector.broadcast %cst_123 : f32 to vector<16x1xf32>
    %323 = arith.divf %321, %322 : vector<16x1xf32>
    %324 = vector.broadcast %314 : vector<16x1xf32> to vector<16x64xf32>
    %325 = arith.subf %306, %324 : vector<16x64xf32>
    %cst_124 = arith.constant 9.99999974E-6 : f32
    %326 = vector.broadcast %cst_124 : f32 to vector<16x1xf32>
    %327 = arith.addf %323, %326 : vector<16x1xf32>
    %328 = math.rsqrt %327 : vector<16x1xf32>
    %329 = vector.broadcast %328 : vector<16x1xf32> to vector<16x64xf32>
    %330 = arith.mulf %325, %329 : vector<16x64xf32>
    %331 = vector.broadcast %308 : vector<1x64xf32> to vector<16x64xf32>
    %332 = arith.mulf %330, %331 : vector<16x64xf32>
    %333 = vector.broadcast %310 : vector<1x64xf32> to vector<16x64xf32>
    %334 = arith.addf %332, %333 : vector<16x64xf32>
    %c1_125 = arith.constant 1 : index
    %c0_126 = arith.constant 0 : index
    %c0_127 = arith.constant 0 : index
    %335 = vector.load %arg4[%c1_125, %c0_126, %c0_127] : memref<2x64x256xbf16, #tpu.memory_space<vmem>>, vector<1x64x256xbf16>
    %336 = vector.shape_cast %335 : vector<1x64x256xbf16> to vector<64x256xbf16>
    %337 = arith.truncf %334 : vector<16x64xf32> to vector<16x64xbf16>
    %cst_128 = arith.constant dense<0.000000e+00> : vector<16x256xf32>
    %338 = tpu.matmul %337, %336, %cst_128 {dimension_numbers = #tpu.dot_dimension_numbers<[1], [0], [0], [1], [0, 0, 1, 1], [], []>} : vector<16x64xbf16>, vector<64x256xbf16>, vector<16x256xf32> -> vector<16x256xf32>
    %c1_129 = arith.constant 1 : index
    %c0_130 = arith.constant 0 : index
    %c0_131 = arith.constant 0 : index
    %339 = vector.load %arg9[%c1_129, %c0_130, %c0_131] : memref<2x1x256xf32, #tpu.memory_space<vmem>>, vector<1x1x256xf32>
    %340 = vector.shape_cast %339 : vector<1x1x256xf32> to vector<1x256xf32>
    %341 = vector.broadcast %340 : vector<1x256xf32> to vector<16x256xf32>
    %342 = arith.addf %338, %341 : vector<16x256xf32>
    %cst_132 = arith.constant 5.000000e-01 : f32
    %343 = vector.broadcast %cst_132 : f32 to vector<16x256xf32>
    %344 = arith.mulf %343, %342 : vector<16x256xf32>
    %cst_133 = arith.constant 0.707106769 : f32
    %345 = vector.broadcast %cst_133 : f32 to vector<16x256xf32>
    %346 = arith.mulf %342, %345 : vector<16x256xf32>
    %347 = math.absf %346 : vector<16x256xf32>
    %cst_134 = arith.constant 0.327591091 : f32
    %348 = vector.broadcast %cst_134 : f32 to vector<16x256xf32>
    %349 = arith.mulf %348, %347 : vector<16x256xf32>
    %cst_135 = arith.constant 1.000000e+00 : f32
    %350 = vector.broadcast %cst_135 : f32 to vector<16x256xf32>
    %351 = arith.addf %350, %349 : vector<16x256xf32>
    %cst_136 = arith.constant 1.000000e+00 : f32
    %352 = vector.broadcast %cst_136 : f32 to vector<16x256xf32>
    %353 = arith.divf %352, %351 : vector<16x256xf32>
    %cst_137 = arith.constant 1.06140542 : f32
    %354 = vector.broadcast %cst_137 : f32 to vector<16x256xf32>
    %355 = arith.mulf %354, %353 : vector<16x256xf32>
    %cst_138 = arith.constant 1.45315206 : f32
    %356 = vector.broadcast %cst_138 : f32 to vector<16x256xf32>
    %357 = arith.subf %355, %356 : vector<16x256xf32>
    %358 = arith.mulf %357, %353 : vector<16x256xf32>
    %cst_139 = arith.constant 1.42141378 : f32
    %359 = vector.broadcast %cst_139 : f32 to vector<16x256xf32>
    %360 = arith.addf %358, %359 : vector<16x256xf32>
    %361 = arith.mulf %360, %353 : vector<16x256xf32>
    %cst_140 = arith.constant 0.284496725 : f32
    %362 = vector.broadcast %cst_140 : f32 to vector<16x256xf32>
    %363 = arith.subf %361, %362 : vector<16x256xf32>
    %364 = arith.mulf %363, %353 : vector<16x256xf32>
    %cst_141 = arith.constant 0.254829586 : f32
    %365 = vector.broadcast %cst_141 : f32 to vector<16x256xf32>
    %366 = arith.addf %364, %365 : vector<16x256xf32>
    %367 = arith.mulf %366, %353 : vector<16x256xf32>
    %cst_142 = arith.constant 0.000000e+00 : f32
    %368 = vector.broadcast %cst_142 : f32 to vector<16x256xf32>
    %369 = arith.subf %368, %347 : vector<16x256xf32>
    %370 = arith.mulf %369, %347 : vector<16x256xf32>
    %371 = math.exp %370 : vector<16x256xf32>
    %372 = arith.mulf %367, %371 : vector<16x256xf32>
    %cst_143 = arith.constant 1.000000e+00 : f32
    %373 = vector.broadcast %cst_143 : f32 to vector<16x256xf32>
    %374 = arith.subf %373, %372 : vector<16x256xf32>
    %cst_144 = arith.constant 0.000000e+00 : f32
    %375 = vector.broadcast %cst_144 : f32 to vector<16x256xf32>
    %376 = arith.cmpf olt, %346, %375 : vector<16x256xf32>
    %cst_145 = arith.constant 0.000000e+00 : f32
    %377 = vector.broadcast %cst_145 : f32 to vector<16x256xf32>
    %378 = arith.subf %377, %374 : vector<16x256xf32>
    %379 = arith.select %376, %378, %374 : vector<16x256xi1>, vector<16x256xf32>
    %cst_146 = arith.constant 1.000000e+00 : f32
    %380 = vector.broadcast %cst_146 : f32 to vector<16x256xf32>
    %381 = arith.addf %380, %379 : vector<16x256xf32>
    %382 = arith.mulf %344, %381 : vector<16x256xf32>
    %c1_147 = arith.constant 1 : index
    %c0_148 = arith.constant 0 : index
    %c0_149 = arith.constant 0 : index
    %383 = vector.load %arg5[%c1_147, %c0_148, %c0_149] : memref<2x256x64xbf16, #tpu.memory_space<vmem>>, vector<1x256x64xbf16>
    %384 = vector.shape_cast %383 : vector<1x256x64xbf16> to vector<256x64xbf16>
    %385 = arith.truncf %382 : vector<16x256xf32> to vector<16x256xbf16>
    %cst_150 = arith.constant dense<0.000000e+00> : vector<16x64xf32>
    %386 = tpu.matmul %385, %384, %cst_150 {dimension_numbers = #tpu.dot_dimension_numbers<[1], [0], [0], [1], [0, 0, 1, 1], [], []>} : vector<16x256xbf16>, vector<256x64xbf16>, vector<16x64xf32> -> vector<16x64xf32>
    %387 = arith.addf %306, %386 : vector<16x64xf32>
    %c11 = arith.constant 11 : index
    %c0_151 = arith.constant 0 : index
    %c0_152 = arith.constant 0 : index
    %388 = vector.load %arg7[%c11, %c0_151, %c0_152] : memref<14x1x64xf32, #tpu.memory_space<vmem>>, vector<1x1x64xf32>
    %389 = vector.shape_cast %388 : vector<1x1x64xf32> to vector<1x64xf32>
    %390 = vector.broadcast %389 : vector<1x64xf32> to vector<16x64xf32>
    %391 = arith.addf %387, %390 : vector<16x64xf32>
    %c12 = arith.constant 12 : index
    %c0_153 = arith.constant 0 : index
    %c0_154 = arith.constant 0 : index
    %392 = vector.load %arg7[%c12, %c0_153, %c0_154] : memref<14x1x64xf32, #tpu.memory_space<vmem>>, vector<1x1x64xf32>
    %393 = vector.shape_cast %392 : vector<1x1x64xf32> to vector<1x64xf32>
    %c13 = arith.constant 13 : index
    %c0_155 = arith.constant 0 : index
    %c0_156 = arith.constant 0 : index
    %394 = vector.load %arg7[%c13, %c0_155, %c0_156] : memref<14x1x64xf32, #tpu.memory_space<vmem>>, vector<1x1x64xf32>
    %395 = vector.shape_cast %394 : vector<1x1x64xf32> to vector<1x64xf32>
    %cst_157 = arith.constant dense<0.000000e+00> : vector<16xf32>
    %396 = vector.multi_reduction <add>, %391, %cst_157 [1] : vector<16x64xf32> to vector<16xf32>
    %397 = vector.shape_cast %396 : vector<16xf32> to vector<16x1xf32>
    %cst_158 = arith.constant 6.400000e+01 : f32
    %398 = vector.broadcast %cst_158 : f32 to vector<16x1xf32>
    %399 = arith.divf %397, %398 : vector<16x1xf32>
    %400 = vector.broadcast %399 : vector<16x1xf32> to vector<16x64xf32>
    %401 = arith.subf %391, %400 : vector<16x64xf32>
    %402 = vector.broadcast %399 : vector<16x1xf32> to vector<16x64xf32>
    %403 = arith.subf %391, %402 : vector<16x64xf32>
    %404 = arith.mulf %401, %403 : vector<16x64xf32>
    %cst_159 = arith.constant dense<0.000000e+00> : vector<16xf32>
    %405 = vector.multi_reduction <add>, %404, %cst_159 [1] : vector<16x64xf32> to vector<16xf32>
    %406 = vector.shape_cast %405 : vector<16xf32> to vector<16x1xf32>
    %cst_160 = arith.constant 6.400000e+01 : f32
    %407 = vector.broadcast %cst_160 : f32 to vector<16x1xf32>
    %408 = arith.divf %406, %407 : vector<16x1xf32>
    %409 = vector.broadcast %399 : vector<16x1xf32> to vector<16x64xf32>
    %410 = arith.subf %391, %409 : vector<16x64xf32>
    %cst_161 = arith.constant 9.99999974E-6 : f32
    %411 = vector.broadcast %cst_161 : f32 to vector<16x1xf32>
    %412 = arith.addf %408, %411 : vector<16x1xf32>
    %413 = math.rsqrt %412 : vector<16x1xf32>
    %414 = vector.broadcast %413 : vector<16x1xf32> to vector<16x64xf32>
    %415 = arith.mulf %410, %414 : vector<16x64xf32>
    %416 = vector.broadcast %393 : vector<1x64xf32> to vector<16x64xf32>
    %417 = arith.mulf %415, %416 : vector<16x64xf32>
    %418 = vector.broadcast %395 : vector<1x64xf32> to vector<16x64xf32>
    %419 = arith.addf %417, %418 : vector<16x64xf32>
    %c0_162 = arith.constant 0 : index
    %c0_163 = arith.constant 0 : index
    %420 = vector.load %arg6[%c0_162, %c0_163] : memref<64x128xbf16, #tpu.memory_space<vmem>>, vector<64x128xbf16>
    %421 = arith.truncf %419 : vector<16x64xf32> to vector<16x64xbf16>
    %cst_164 = arith.constant dense<0.000000e+00> : vector<16x128xf32>
    %422 = tpu.matmul %421, %420, %cst_164 {dimension_numbers = #tpu.dot_dimension_numbers<[1], [0], [0], [1], [0, 0, 1, 1], [], []>} : vector<16x64xbf16>, vector<64x128xbf16>, vector<16x128xf32> -> vector<16x128xf32>
    %c0_165 = arith.constant 0 : index
    %c0_166 = arith.constant 0 : index
    %423 = vector.load %arg10[%c0_165, %c0_166] : memref<1x128xf32, #tpu.memory_space<vmem>>, vector<1x128xf32>
    %424 = vector.broadcast %423 : vector<1x128xf32> to vector<16x128xf32>
    %425 = arith.addf %422, %424 : vector<16x128xf32>
    %c0_167 = arith.constant 0 : index
    %c0_168 = arith.constant 0 : index
    %426 = vector.load %arg11[%c0_167, %c0_168] : memref<16x128xf32, #tpu.memory_space<vmem>>, vector<16x128xf32>
    tpu.vector_store %arg11[%c0_167, %c0_168], %425 {strides = array<i32>} : memref<16x128xf32, #tpu.memory_space<vmem>>, vector<16x128xf32>,
    return
  }
}

</mosaic_0001>

<bundles_post_ra>
// kernel: gpt_forward.1
= control target key start
LH: loop header
LB: loop body
LE: loop exit
PB: predicated region body
PF: predicated region fallthrough
CT: control target
= control target key end

     0   :  { %vm47_vm0 = vcmask 523264   ;;  %s4922_s0 = inlined_call_operand.vmem [shape: f32[16,64], index: 0, kind: input, shape index: {}]   ;;  %s4923_s1 = inlined_call_operand.vmem [shape: f32[16,16], index: 1, kind: input, shape index: {}]   ;;  %s4924_s2 = inlined_call_operand.vmem [shape: bf16[2,64,192], index: 2, kind: input, shape index: {}]   ;;  %s4925_s3 = inlined_call_operand.vmem [shape: bf16[2,64,64], index: 3, kind: input, shape index: {}]   ;;  %s4926_s4 = inlined_call_operand.vmem [shape: bf16[2,64,256], index: 4, kind: input, shape index: {}]   ;;  %s4927_s5 = inlined_call_operand.vmem [shape: bf16[2,256,64], index: 5, kind: input, shape index: {}]   ;;  %s4928_s6 = inlined_call_operand.vmem [shape: bf16[64,128], index: 6, kind: input, shape index: {}]   ;;  %s4929_s7 = inlined_call_operand.vmem [shape: f32[14,1,64], index: 7, kind: input, shape index: {}]   ;;  %s4930_s8 = inlined_call_operand.vmem [shape: f32[2,1,192], index: 8, kind: input, shape index: {}]   ;;  %s4931_s9 = inlined_call_operand.vmem [shape: f32[2,1,256], index: 9, kind: input, shape index: {}]   ;;  %s4932_s10 = inlined_call_operand.vmem [shape: f32[1,128], index: 10, kind: input, shape index: {}]   ;;  %s4933_s11 = inlined_call_operand.hbm [shape: f32[16,128], index: 11, kind: output, shape index: {}]  }
   0x1   :  { %v4229_v0 = vld [vmem:[%s4922_s0] sm:$0xff]  ;;  %v4234_v1 = vld [vmem:[%s4922_s0 + $0x8] sm:$0xff] }
   0x2   :  { %v48_v2 = vsel %vm47_vm0, %v4229_v0, 0.0  ;;  %v51_v3 = vsel %vm47_vm0, %v4234_v1, 0.0 }
   0x3   :  { %49 = vadd.xlane.f32.xlu0 %v48_v2 }
   0x7   :  { %52 = vadd.xlane.f32.xlu0 %v51_v3 }
   0x8   :  { %16 = vsyncpa [#allocation3], 0  ;;  %v3919_v14 = vld [vmem:[%s4924_s2 + $0x4] ss:$8 sps:$4 sm:$0xff]   ;;  %v3921_v15 = vld [vmem:[%s4924_s2] ss:$8 sps:$4 sm:$0xff]   ;;  %v102_v40 = vlaneseq }
   0x9   :  { %155 = vmatprep.subr.bf16.mxu0 %v3919_v14  ;;  %v3922_v16 = vld [vmem:[%s4924_s2 + $0x14] ss:$8 sps:$4 sm:$0xff]   ;;  %v3924_v17 = vld [vmem:[%s4924_s2 + $0x10] ss:$8 sps:$4 sm:$0xff]   ;;  %v3925_v18 = vld [vmem:[%s4924_s2 + $0x24] ss:$8 sps:$4 sm:$0xff]  }
   0xa   :  { %156 = vmatpush1.bf16.msra.mxu0 %v3921_v15  ;;  %v3927_v19 = vld [vmem:[%s4924_s2 + $0x20] ss:$8 sps:$4 sm:$0xff]   ;;  %v3928_v20 = vld [vmem:[%s4924_s2 + $0x34] ss:$8 sps:$4 sm:$0xff]   ;;  %v3930_v21 = vld [vmem:[%s4924_s2 + $0x30] ss:$8 sps:$4 sm:$0xff]  }
   0xb   :  { %157 = vmatprep.subr.bf16.mxu0 %v3922_v16  ;;  %v4153_v22 = vmov 0   ;;  %v3223_v31 = vld [vmem:[%s4929_s7] ss:$0 sm:$0xff]  ;;  %v3224_v35 = vld [vmem:[%s4929_s7 + $0x1] ss:$0 sm:$0xff]  ;;  %v103_v41 = vshrl.u32 %v102_v40, 7 }
   0xc   :  { %187 = vmatprep.mubr.bf16.mxu0 %v4153_v22  ;;  %v100_v43 = vld [vmem:[%s4930_s8] sm:$0x3]  ;;  %vm204_vm1 = vcmask 130048   ;;  %s4154_s22 = smov 64   ;;  %s4155_s23 = smov 32   ;;  %v4313_v3 = vld [vmem:[%s4923_s1 + $0x8] sm:$0xff] }
   0xd   :  { %v4276_v42 = vsub.s32 0, %v103_v41  ;;  %v4281_v44 = vsub.s32 1, %v103_v41  ;;  %s4156_s24 = smov 112   ;;  %s4157_s25 = smov 96   ;;  %vm4296_vm2 = vmpackc.low %vm204_vm1, %vm204_vm1  ;;  %v4308_v63 = vld [vmem:[%s4923_s1] sm:$0xff]  ;;  %vm4162_vm3 = vmmov 0  }
   0xe   :  { %158 = vmatpush1.bf16.msra.mxu0 %v3924_v17  ;;  %s4158_s26 = smov 80   ;;  %s4159_s12 = smov 48   ;;  %vm1019_vm4 = vcmask 261120   ;;  %vm1022_vm5 = vcmask 392192  }
   0xf   :  { %159 = vmatprep.subr.bf16.mxu0 %v3925_v18  ;;  %v105_v45 = vrot.slane %v100_v43, %v4276_v42  ;;  %v109_v47 = vrot.slane %v100_v43, %v4281_v44  ;;  %s4160_s13 = smov 16  }
  0x12   :  { %160 = vmatpush1.bf16.msra.mxu0 %v3927_v19 }
  0x13   :  { %161 = vmatprep.subr.bf16.mxu0 %v3928_v20 }
  0x16   :  { %162 = vmatpush1.bf16.msra.mxu0 %v3930_v21 }
  0x90   :  { %v50_v4 = vpop.xlane.xlu0 %49 }
  0x91   :  { %v55_v5 = vmul.f32 0.015625, %v50_v4 }
  0x93   :  { %v57_v6 = vsub.f32 %v4229_v0, %v55_v5 }
  0x94   :  { %v53_v7 = vpop.xlane.xlu0 %52 }
  0x95   :  { %v56_v8 = vmul.f32 0.015625, %v53_v7  ;;  %v59_v9 = vmul.f32 %v57_v6, %v57_v6 }
  0x97   :  { %v58_v10 = vsub.f32 %v4234_v1, %v56_v8  ;;  %v61_v11 = vsel %vm47_vm0, %v59_v9, 0.0 }
  0x98   :  { %62 = vadd.xlane.f32.xlu1 %v61_v11 }
  0x99   :  { %v60_v12 = vmul.f32 %v58_v10, %v58_v10 }
  0x9b   :  { %v64_v13 = vsel %vm47_vm0, %v60_v12, 0.0 }
  0x9c   :  { %65 = vadd.xlane.f32.xlu1 %v64_v13 }
 0x125   :  { %v63_v23 = vpop.xlane.xlu1 %62 }
 0x126   :  { %v67_v24 = vmul.f32 0.015625, %v63_v23 }
 0x128   :  { %v69_v25 = vadd.f32 1e-05, %v67_v24 }
 0x129   :  { %v66_v26 = vpop.xlane.xlu1 %65 }
 0x12a   :  { %4011 = vrsqrt.f32 %v69_v25  ;;  %v68_v27 = vmul.f32 0.015625, %v66_v26 }
 0x12c   :  { %v70_v28 = vadd.f32 1e-05, %v68_v27 }
 0x12e   :  { %4013 = vrsqrt.f32 %v70_v28 }
 0x134   :  { %v4012_v29 = vpop.eup %4011 }
 0x135   :  { %v73_v30 = vmul.f32 %v4012_v29, %v57_v6 }
 0x137   :  { %v81_v34 = vmul.f32 %v3223_v31, %v73_v30 }
 0x138   :  { %v4014_v32 = vpop.eup %4013 }
 0x139   :  { %v74_v33 = vmul.f32 %v4014_v32, %v58_v10  ;;  %v89_v37 = vadd.f32 %v3224_v35, %v81_v34 }
 0x13b   :  { %v82_v36 = vmul.f32 %v3223_v31, %v74_v33 }
 0x13d   :  { %v90_v38 = vadd.f32 %v3224_v35, %v82_v36 }
 0x13f   :  { %v99_v39 = vpack.c.bf16 %v90_v38, %v89_v37 }
 0x141   :  { %3233 = vmatmul.mubr.msk.bf16.vlgmr.msra.gmra.mrb[0].mxu0 %vm47_vm0, %v99_v39 }
 0x214   :  { %v189_v46 = vpop.f32.mrb[0].mxu0 }
 0x215   :  { %v190_v48 = vadd.f32 %v189_v46, %v105_v45  ;;  %v191_v49 = vpop.f32.mrb[1].mxu0 }
 0x216   :  { %v193_v50 = vpop.f32.mrb[2].mxu0  ;;  %v192_v53 = vadd.f32 %v191_v49, %v109_v47 }
 0x217   :  { %v194_v51 = vadd.f32 %v193_v50, %v105_v45  ;;  %v195_v52 = vpop.f32.mrb[3].mxu0  ;;  %3582 = vmatprep.mubr.msk.f32.mxu1 %vm204_vm1, %v190_v48 }
 0x218   :  { %v196_v54 = vadd.f32 %v195_v52, %v109_v47 }
 0x219   :  { %v3819_v55 = vpack.i.bf16 %v194_v51, %v190_v48 }
 0x21a   :  { %v3732_v56 = vpack.c.bf16 %v196_v54, %v192_v53  ;;  %v4286_v57 = vpack.i.bf16 %v196_v54, %v192_v53 }
 0x21b   :  { %3820 = vrot.lane.b32.xlu0 %v3819_v55, %s4154_s22 }
 0x21f   :  { %3830 = vrot.lane.b32.xlu0 %v3819_v55, %s4155_s23 }
 0x223   :  { %391 = vrot.lane.b32.xlu0 %v190_v48, %s4156_s24 }
 0x227   :  { %393 = vrot.lane.b32.xlu0 %v194_v51, %s4156_s24 }
 0x22b   :  { %593 = vrot.lane.b32.xlu0 %v190_v48, %s4157_s25 }
 0x22f   :  { %793 = vrot.lane.b32.xlu0 %v190_v48, %s4158_s26 }
 0x28d   :  { %v3821_v58 = vpop.permute.xlu0 %3820 }
 0x28e   :  { %v3823_v59 = vunpack.i.h.bf16 %v3821_v58  ;;  %v3822_v60 = vunpack.i.l.bf16 %v3821_v58 }
 0x290   :  { %v3726_v62 = vpack.c.bf16 %v3823_v59, %v3822_v60 }
 0x291   :  { %v3831_v23 = vpop.permute.xlu0 %3830 }
 0x292   :  { %3728 = vmatprep.subr.msk.bf16.mxu1 %vm4296_vm2, %v3726_v62  ;;  %v3833_v29 = vunpack.i.h.bf16 %v3831_v23  ;;  %v3832_v30 = vunpack.i.l.bf16 %v3831_v23 }
 0x293   :  { %3731 = vmatpush3.bf16.xpose.msk.msra.mxu1 %vm4296_vm2, %v3726_v62 }
 0x294   :  { %3733 = vmatprep.subr.bf16.mxu1 %v3732_v56  ;;  %v3746_v34 = vpack.c.bf16 %v3833_v29, %v3832_v30 }
 0x295   :  { %v392_v31 = vpop.permute.xlu0 %391 }
 0x299   :  { %v394_v36 = vpop.permute.xlu0 %393 }
 0x29a   :  { %3583 = vmatmul.mubr.msk.f32.vlgmr.msra.gmra.mrb[0].mxu1 %vm204_vm1, %v194_v51 }
 0x29b   :  { %3735 = vmatpush3.bf16.msra.mxu1 %v3732_v56 }
 0x29d   :  { %v594_v39 = vpop.permute.xlu0 %593 }
 0x2a1   :  { %v794_v43 = vpop.permute.xlu0 %793 }
 0x36d   :  { %v3584_v2 = vpop.f32.mrb[0].mxu1 }
 0x36e   :  { %v279_v4 = vpop.f32.mrb[1].mxu1  ;;  %v285_v6 = vadd.f32 %v3584_v2, %v4313_v3 }
 0x36f   :  { %v280_v5 = vadd.f32 %v279_v4, %v4308_v63 }
 0x370   :  { %v291_v8 = vsel %vm204_vm1, %v285_v6, -inf }
 0x371   :  { %v288_v7 = vsel %vm204_vm1, %v280_v5, -inf }
 0x372   :  { %289 = vmax.xlane.f32.xlu1 %v288_v7 }
 0x376   :  { %292 = vmax.xlane.f32.xlu1 %v291_v8 }
 0x3ff   :  { %v290_v9 = vpop.xlane.xlu1 %289 }
 0x400   :  { %v294_v10 = vsub.f32 %v280_v5, %v290_v9 }
 0x402   :  { %v296_v13 = vmul.f32 1.442695, %v294_v10 }
 0x403   :  { %v293_v11 = vpop.xlane.xlu1 %292 }
 0x404   :  { %v295_v12 = vsub.f32 %v285_v6, %v293_v11 }
 0x406   :  { %v298_v14 = vmul.f32 1.442695, %v295_v12 }
 0x408   :  { %4015 = vpow2.f32 %v298_v14 }
 0x409   :  { %4017 = vpow2.f32 %v296_v13 }
 0x412   :  { %v4016_v15 = vpop.eup %4015 }
 0x413   :  { %v303_v16 = vsel %vm204_vm1, %v4016_v15, 0.0  ;;  %v4018_v17 = vpop.eup %4017 }
 0x414   :  { %304 = vadd.xlane.f32.xlu1 %v303_v16  ;;  %v300_v18 = vsel %vm204_vm1, %v4018_v17, 0.0 }
 0x418   :  { %301 = vadd.xlane.f32.xlu1 %v300_v18 }
 0x429   :  { %3825 = vrot.lane.b32.xlu1 %v3819_v55, %s4159_s12 }
 0x42d   :  { %3835 = vrot.lane.b32.xlu1 %v3819_v55, %s4160_s13 }
 0x431   :  { %595 = vrot.lane.b32.xlu1 %v194_v51, %s4157_s25 }
 0x435   :  { %795 = vrot.lane.b32.xlu1 %v194_v51, %s4158_s26 }
 0x4a1   :  { %v305_v19 = vpop.xlane.xlu1 %304 }
 0x4a2   :  { %4019 = vrcp.f32 %v305_v19 }
 0x4a5   :  { %v302_v20 = vpop.xlane.xlu1 %301 }
 0x4a6   :  { %4021 = vrcp.f32 %v302_v20 }
 0x4a9   :  { %v3826_v21 = vpop.permute.xlu1 %3825 }
 0x4aa   :  { %v3828_v24 = vunpack.i.h.bf16 %v3826_v21  ;;  %v3827_v25 = vunpack.i.l.bf16 %v3826_v21 }
 0x4ac   :  { %v3736_v26 = vpack.c.bf16 %v3828_v24, %v3827_v25  ;;  %v4020_v27 = vpop.eup %4019 }
 0x4ad   :  { %v309_v33 = vmul.f32 %v4020_v27, %v4016_v15  ;;  %v3836_v35 = vpop.permute.xlu1 %3835 }
 0x4ae   :  { %3738 = vmatprep.subr.msk.bf16.mxu1 %vm4296_vm2, %v3736_v26  ;;  %v3838_v37 = vunpack.i.h.bf16 %v3836_v35  ;;  %v3837_v38 = vunpack.i.l.bf16 %v3836_v35 }
 0x4b0   :  { %v4022_v28 = vpop.eup %4021  ;;  %v3756_v40 = vpack.c.bf16 %v3838_v37, %v3837_v38 }
 0x4b1   :  { %v308_v32 = vmul.f32 %v4022_v28, %v4018_v17  ;;  %v596_v41 = vpop.permute.xlu1 %595 }
 0x4b3   :  { %3589 = vmatprep.mubr.msk.f32.mxu1 %vm204_vm1, %v308_v32 }
 0x4b4   :  { %3590 = vmatmul.mubr.msk.f32.vlgmr.msra.gmra.mrb[2].mxu1 %vm204_vm1, %v309_v33 }
 0x4b5   :  { %3741 = vmatpush3.bf16.xpose.msk.msra.mxu1 %vm4296_vm2, %v3736_v26  ;;  %3596 = vmatprep.mubr.msk.f32.mxu1 %vm204_vm1, %v392_v31  ;;  %v796_v45 = vpop.permute.xlu1 %795 }
 0x4b6   :  { %3748 = vmatprep.subr.msk.bf16.mxu1 %vm4296_vm2, %v3746_v34 }
 0x4bc   :  { %3597 = vmatmul.mubr.msk.f32.vlgmr.msra.gmra.mrb[4].mxu1 %vm204_vm1, %v394_v36 }
 0x4bd   :  { %3751 = vmatpush3.bf16.xpose.msk.msra.mxu1 %vm4296_vm2, %v3746_v34  ;;  %3610 = vmatprep.mubr.msk.f32.mxu1 %vm204_vm1, %v594_v39 }
 0x4be   :  { %3758 = vmatprep.subr.msk.bf16.mxu1 %vm4296_vm2, %v3756_v40 }
 0x4c4   :  { %3611 = vmatmul.mubr.msk.f32.vlgmr.msra.gmra.mrb[6].mxu1 %vm204_vm1, %v596_v41 }
 0x4c5   :  { %3761 = vmatpush3.bf16.xpose.msk.msra.mxu1 %vm4296_vm2, %v3756_v40  ;;  %3624 = vmatprep.mubr.msk.f32.mxu1 %vm204_vm1, %v794_v43 }
 0x4cc   :  { %3625 = vmatmul.mubr.msk.f32.vlgmr.msra.gmra.mrb[8].mxu1 %vm204_vm1, %v796_v45 }
 0x587   :  { %v4345_v46 = vpop.f32.mrb[2].mxu1 }
 0x588   :  { %v4347_v47 = vpop.f32.mrb[3].mxu1 }
 0x58f   :  { %v3598_v48 = vpop.f32.mrb[4].mxu1 }
 0x590   :  { %v479_v49 = vadd.f32 %v3598_v48, %v4313_v3  ;;  %v473_v50 = vpop.f32.mrb[5].mxu1 }
 0x591   :  { %v474_v51 = vadd.f32 %v473_v50, %v4308_v63 }
 0x592   :  { %v485_v52 = vsel %vm204_vm1, %v479_v49, -inf }
 0x593   :  { %486 = vmax.xlane.f32.xlu1 %v485_v52  ;;  %v482_v53 = vsel %vm204_vm1, %v474_v51, -inf }
 0x594   :  { %483 = vmax.xlane.f32.xlu0 %v482_v53 }
 0x597   :  { %v3612_v54 = vpop.f32.mrb[6].mxu1 }
 0x598   :  { %v681_v55 = vadd.f32 %v3612_v54, %v4313_v3  ;;  %v675_v56 = vpop.f32.mrb[7].mxu1 }
 0x599   :  { %v676_v58 = vadd.f32 %v675_v56, %v4308_v63 }
 0x59a   :  { %v687_v59 = vsel %vm204_vm1, %v681_v55, -inf }
 0x59b   :  { %688 = vmax.xlane.f32.xlu0 %v687_v59  ;;  %v684_v60 = vsel %vm204_vm1, %v676_v58, -inf }
 0x59f   :  { %v3626_v62 = vpop.f32.mrb[8].mxu1  ;;  %685 = vmax.xlane.f32.xlu0 %v684_v60 }
 0x5a0   :  { %v881_v2 = vadd.f32 %v3626_v62, %v4313_v3  ;;  %v875_v4 = vpop.f32.mrb[9].mxu1 }
 0x5a1   :  { %v876_v5 = vadd.f32 %v875_v4, %v4308_v63 }
 0x5a2   :  { %v887_v6 = vsel %vm204_vm1, %v881_v2, -inf }
 0x5a3   :  { %888 = vmax.xlane.f32.xlu1 %v887_v6  ;;  %v884_v7 = vsel %vm204_vm1, %v876_v5, -inf }
 0x5a4   :  { %885 = vmax.xlane.f32.xlu0 %v884_v7 }
 0x620   :  { %v487_v8 = vpop.xlane.xlu1 %486 }
 0x621   :  { %v489_v9 = vsub.f32 %v479_v49, %v487_v8  ;;  %v484_v10 = vpop.xlane.xlu0 %483 }
 0x622   :  { %v488_v11 = vsub.f32 %v474_v51, %v484_v10 }
 0x623   :  { %v492_v12 = vmul.f32 1.442695, %v489_v9 }
 0x624   :  { %v490_v13 = vmul.f32 1.442695, %v488_v11 }
 0x625   :  { %4023 = vpow2.f32 %v492_v12  ;;  %v3931_v12 = vld [vmem:[%s4925_s3] sm:$0xff]  }
 0x626   :  { %4025 = vpow2.f32 %v490_v13  ;;  %v4161_v13 = vmov 0.0  }
 0x628   :  { %v689_v14 = vpop.xlane.xlu0 %688 }
 0x629   :  { %v691_v15 = vsub.f32 %v681_v55, %v689_v14  ;;  %v3932_v14 = vld [vmem:[%s4925_s3 + $0x8] sm:$0xff]  }
 0x62b   :  { %v694_v3 = vmul.f32 1.442695, %v691_v15  ;;  %v3933_v15 = vld [vmem:[%s4925_s3 + $0x10] sm:$0xff]  }
 0x62c   :  { %v686_v16 = vpop.xlane.xlu0 %685 }
 0x62d   :  { %4027 = vpow2.f32 %v694_v3  ;;  %v690_v63 = vsub.f32 %v676_v58, %v686_v16  ;;  %v3934_v3 = vld [vmem:[%s4925_s3 + $0x18] sm:$0xff]  }
 0x62f   :  { %v4361_v17 = vpop.eup %4023  ;;  %v692_v18 = vmul.f32 1.442695, %v690_v63 }
 0x630   :  { %v4026_v19 = vpop.eup %4025  ;;  %v889_v20 = vpop.xlane.xlu1 %888  ;;  %v497_v21 = vsel %vm204_vm1, %v4361_v17, 0.0 }
 0x631   :  { %4029 = vpow2.f32 %v692_v18  ;;  %v891_v23 = vsub.f32 %v881_v2, %v889_v20  ;;  %498 = vadd.xlane.f32.xlu1 %v497_v21  ;;  %v886_v24 = vpop.xlane.xlu0 %885  ;;  %v494_v25 = vsel %vm204_vm1, %v4026_v19, 0.0 }
 0x632   :  { %v890_v26 = vsub.f32 %v876_v5, %v886_v24  ;;  %495 = vadd.xlane.f32.xlu0 %v494_v25 }
 0x633   :  { %v894_v27 = vmul.f32 1.442695, %v891_v23 }
 0x634   :  { %v892_v28 = vmul.f32 1.442695, %v890_v26 }
 0x635   :  { %4031 = vpow2.f32 %v894_v27 }
 0x636   :  { %4033 = vpow2.f32 %v892_v28 }
 0x637   :  { %v4028_v29 = vpop.eup %4027 }
 0x638   :  { %v699_v30 = vsel %vm204_vm1, %v4028_v29, 0.0 }
 0x639   :  { %700 = vadd.xlane.f32.xlu1 %v699_v30 }
 0x63b   :  { %v4030_v31 = vpop.eup %4029 }
 0x63c   :  { %v696_v32 = vsel %vm204_vm1, %v4030_v31, 0.0 }
 0x63d   :  { %697 = vadd.xlane.f32.xlu0 %v696_v32 }
 0x63f   :  { %v4032_v33 = vpop.eup %4031 }
 0x640   :  { %v4034_v34 = vpop.eup %4033  ;;  %v899_v35 = vsel %vm204_vm1, %v4032_v33, 0.0 }
 0x641   :  { %900 = vadd.xlane.f32.xlu1 %v899_v35  ;;  %v896_v36 = vsel %vm204_vm1, %v4034_v34, 0.0 }
 0x642   :  { %897 = vadd.xlane.f32.xlu0 %v896_v36 }
 0x652   :  { %3845 = vrot.lane.b32.xlu1 %v4286_v57, %s4157_s25 }
 0x656   :  { %3850 = vrot.lane.b32.xlu1 %v4286_v57, %s4158_s26 }
 0x658   :  { %3840 = vrot.lane.b32.xlu0 %v4286_v57, %s4156_s24 }
 0x6be   :  { %v499_v38 = vpop.xlane.xlu1 %498 }
 0x6bf   :  { %v496_v37 = vpop.xlane.xlu0 %495 }
 0x6c0   :  { %4035 = vrcp.f32 %v496_v37 }
 0x6c1   :  { %4037 = vrcp.f32 %v499_v38 }
 0x6c6   :  { %v701_v40 = vpop.xlane.xlu1 %700 }
 0x6ca   :  { %v4036_v39 = vpop.eup %4035  ;;  %v698_v41 = vpop.xlane.xlu0 %697 }
 0x6cb   :  { %v502_v43 = vmul.f32 %v4036_v39, %v4026_v19  ;;  %4039 = vrcp.f32 %v698_v41  ;;  %v4038_v56 = vpop.eup %4037 }
 0x6cc   :  { %v503_v6 = vmul.f32 %v4038_v56, %v4361_v17 }
 0x6cd   :  { %3603 = vmatprep.mubr.msk.f32.mxu0 %vm204_vm1, %v502_v43  ;;  %v3264_v43 = vld [vmem:[%s4929_s7 + $0x2] ss:$0 sm:$0xff] }
 0x6ce   :  { %v901_v45 = vpop.xlane.xlu1 %900 }
 0x6cf   :  { %4041 = vrcp.f32 %v901_v45  ;;  %v898_v48 = vpop.xlane.xlu0 %897 }
 0x6d0   :  { %4043 = vrcp.f32 %v898_v48 }
 0x6d1   :  { %4045 = vrcp.f32 %v701_v40 }
 0x6d2   :  { %v3846_v49 = vpop.permute.xlu1 %3845 }
 0x6d3   :  { %v3841_v50 = vpop.permute.xlu0 %3840  ;;  %v3848_v51 = vunpack.i.h.bf16 %v3846_v49  ;;  %v3847_v57 = vunpack.i.l.bf16 %v3846_v49 }
 0x6d4   :  { %v3843_v52 = vunpack.i.h.bf16 %v3841_v50  ;;  %v3842_v53 = vunpack.i.l.bf16 %v3841_v50 }
 0x6d5   :  { %v4040_v60 = vpop.eup %4039  ;;  %v3752_v62 = vpack.c.bf16 %v3848_v51, %v3847_v57 }
 0x6d6   :  { %v3742_v54 = vpack.c.bf16 %v3843_v52, %v3842_v53  ;;  %v3851_v55 = vpop.permute.xlu1 %3850  ;;  %v704_v8 = vmul.f32 %v4040_v60, %v4030_v31 }
 0x6d7   :  { %v3853_v58 = vunpack.i.h.bf16 %v3851_v55  ;;  %v3852_v59 = vunpack.i.l.bf16 %v3851_v55 }
 0x6d8   :  { %3743 = vmatprep.subr.bf16.mxu0 %v3742_v54 }
 0x6d9   :  { %v4042_v2 = vpop.eup %4041  ;;  %v3762_v4 = vpack.c.bf16 %v3853_v58, %v3852_v59  ;;  %3745 = vmatpush3.bf16.msra.mxu0 %v3742_v54 }
 0x6da   :  { %v4044_v5 = vpop.eup %4043  ;;  %3753 = vmatprep.subr.bf16.mxu0 %v3752_v62  ;;  %v905_v10 = vmul.f32 %v4042_v2, %v4032_v33  ;;  %v3937_v2 = vld [vmem:[%s4926_s4 + $0x4] ss:$8 sps:$4 sm:$0xff]  }
 0x6db   :  { %v4046_v7 = vpop.eup %4045  ;;  %3763 = vmatprep.subr.bf16.mxu1 %v3762_v4  ;;  %v904_v9 = vmul.f32 %v4044_v5, %v4034_v34  ;;  %v3940_v5 = vld [vmem:[%s4926_s4 + $0x14] ss:$8 sps:$4 sm:$0xff]  }
 0x6dc   :  { %3604 = vmatmul.mubr.msk.f32.vlgmr.msra.gmra.mrb[4].mxu0 %vm204_vm1, %v503_v6  ;;  %3765 = vmatpush3.bf16.msra.mxu1 %v3762_v4  ;;  %v705_v11 = vmul.f32 %v4046_v7, %v4028_v29  ;;  %v3935_v4 = vld [vmem:[%s4926_s4] ss:$8 sps:$4 sm:$0xff]   ;;  %v3938_v6 = vld [vmem:[%s4926_s4 + $0x10] ss:$8 sps:$4 sm:$0xff]   ;;  %v3943_v7 = vld [vmem:[%s4926_s4 + $0x24] ss:$8 sps:$4 sm:$0xff]  }
 0x6dd   :  { %3755 = vmatpush3.bf16.msra.mxu0 %v3752_v62  ;;  %3617 = vmatprep.mubr.msk.f32.mxu0 %vm204_vm1, %v704_v8  ;;  %v3941_v8 = vld [vmem:[%s4926_s4 + $0x20] ss:$8 sps:$4 sm:$0xff]  }
 0x6de   :  { %3631 = vmatprep.mubr.msk.f32.mxu1 %vm204_vm1, %v904_v9  ;;  %3634 = vmatprep.subr.bf16.mxu1 %v4161_v13  ;;  %v3944_v9 = vld [vmem:[%s4926_s4 + $0x30] ss:$8 sps:$4 sm:$0xff]  }
 0x6df   :  { %3632 = vmatmul.mubr.msk.f32.vlgmr.msra.gmra.mrb[10].mxu1 %vm204_vm1, %v905_v10  ;;  %1224 = vmatprep.subr.bf16.mxu0 %v3937_v2  ;;  %v3946_v10 = vld [vmem:[%s4926_s4 + $0x34] ss:$8 sps:$4 sm:$0xff]  }
 0x6e0   :  { %3618 = vmatmul.mubr.msk.f32.vlgmr.msra.gmra.mrb[6].mxu0 %vm204_vm1, %v705_v11  ;;  %3635 = vmatpush3.bf16.msra.mxu1 %v3931_v12 }
 0x6e1   :  { %1256 = vmatprep.mubr.bf16.mxu0 %v4153_v22  ;;  %3636 = vmatprep.subr.bf16.mxu1 %v4161_v13 }
 0x6e2   :  { %3642 = vmatprep.mubr.msk.bf16.mxu1 %vm4162_vm3, %v4161_v13  ;;  %1225 = vmatpush1.bf16.msra.mxu0 %v3935_v4 }
 0x6e3   :  { %1226 = vmatprep.subr.bf16.mxu0 %v3940_v5 }
 0x6e4   :  { %3637 = vmatpush3.bf16.msra.mxu1 %v3932_v14 }
 0x6e5   :  { %3638 = vmatprep.subr.bf16.mxu1 %v4161_v13 }
 0x6e6   :  { %1227 = vmatpush1.bf16.msra.mxu0 %v3938_v6 }
 0x6e7   :  { %1228 = vmatprep.subr.bf16.mxu0 %v3943_v7 }
 0x6e8   :  { %3639 = vmatpush3.bf16.msra.mxu1 %v3933_v15 }
 0x6e9   :  { %3640 = vmatprep.subr.bf16.mxu1 %v4161_v13 }
 0x6ea   :  { %1229 = vmatpush1.bf16.msra.mxu0 %v3941_v8 }
 0x6eb   :  { %1230 = vmatprep.subr.bf16.mxu0 %v3946_v10 }
 0x6ec   :  { %3641 = vmatpush3.bf16.msra.mxu1 %v3934_v3 }
 0x6ee   :  { %1231 = vmatpush1.bf16.msra.mxu0 %v3944_v9 }
 0x7af   :  { %v3605_v16 = vpop.f32.mrb[4].mxu0 }
 0x7b0   :  { %v584_v63 = vpop.f32.mrb[5].mxu0 }
 0x7b1   :  { %v3854_v17 = vpack.i.bf16 %v3605_v16, %v584_v63 }
 0x7b2   :  { %v3633_v18 = vpop.f32.mrb[10].mxu1 }
 0x7b3   :  { %v984_v19 = vpop.f32.mrb[11].mxu1  ;;  %3855 = vrot.lane.b32.xlu1 %v3854_v17, %s4160_s13  ;;  %v3619_v20 = vpop.f32.mrb[6].mxu0 }
 0x7b4   :  { %v3864_v21 = vpack.i.bf16 %v3633_v18, %v984_v19  ;;  %v784_v23 = vpop.f32.mrb[7].mxu0  ;;  %v3267_v18 = vld [vmem:[%s4929_s7 + $0x3] ss:$0 sm:$0xff] }
 0x7b5   :  { %v3859_v24 = vpack.i.bf16 %v3619_v20, %v784_v23  ;;  %v3268_v23 = vld [vmem:[%s4929_s7 + $0x4] ss:$0 sm:$0xff] }
 0x7b7   :  { %3865 = vrot.lane.b32.xlu1 %v3864_v21, %s4159_s12  ;;  %3860 = vrot.lane.b32.xlu0 %v3859_v24, %s4155_s23 }
 0x825   :  { %v3856_v25 = vpop.permute.xlu1 %3855 }
 0x826   :  { %v3858_v26 = vunpack.i.h.bf16 %v3856_v25  ;;  %v3857_v27 = vunpack.i.l.bf16 %v3856_v25 }
 0x828   :  { %v1018_v34 = vsel %vm204_vm1, %v4345_v46, %v3858_v26  ;;  %v1017_v35 = vsel %vm204_vm1, %v4347_v47, %v3857_v27 }
 0x829   :  { %v3866_v28 = vpop.permute.xlu1 %3865  ;;  %v3861_v29 = vpop.permute.xlu0 %3860 }
 0x82a   :  { %v3868_v30 = vunpack.i.h.bf16 %v3866_v28  ;;  %v3867_v31 = vunpack.i.l.bf16 %v3866_v28  ;;  %v3863_v32 = vunpack.i.h.bf16 %v3861_v29  ;;  %v3862_v33 = vunpack.i.l.bf16 %v3861_v29  ;;  %v3947_v28 = vld [vmem:[%s4927_s5 + $0x40] sm:$0xff]  }
 0x82b   :  { %v3948_v29 = vld [vmem:[%s4927_s5] sm:$0xff]   ;;  %3492 = vmatprep.subr.bf16.mxu1 %v3947_v28 }
 0x82c   :  { %v1021_v36 = vsel %vm1019_vm4, %v1018_v34, %v3863_v32  ;;  %v1020_v37 = vsel %vm1019_vm4, %v1017_v35, %v3862_v33  ;;  %v3951_v32 = vld [vmem:[%s4927_s5 + $0x50] sm:$0xff]   ;;  %v3953_v34 = vld [vmem:[%s4927_s5 + $0x58] sm:$0xff]  }
 0x82d   :  { %v1024_v38 = vsel %vm1022_vm5, %v1021_v36, %v3868_v30  ;;  %v1023_v39 = vsel %vm1022_vm5, %v1020_v37, %v3867_v31  ;;  %v3949_v30 = vld [vmem:[%s4927_s5 + $0x48] sm:$0xff]   ;;  %v3952_v33 = vld [vmem:[%s4927_s5 + $0x10] sm:$0xff]   ;;  %v3954_v35 = vld [vmem:[%s4927_s5 + $0x18] sm:$0xff]  }
 0x82e   :  { %v1033_v40 = vpack.c.bf16 %v1024_v38, %v1023_v39  ;;  %v3950_v31 = vld [vmem:[%s4927_s5 + $0x8] sm:$0xff]   ;;  %v3955_v36 = vld [vmem:[%s4927_s5 + $0x60] sm:$0xff]  }
 0x82f   :  { %v3956_v37 = vld [vmem:[%s4927_s5 + $0x20] sm:$0xff]   ;;  %v3957_v38 = vld [vmem:[%s4927_s5 + $0x68] sm:$0xff]  }
 0x830   :  { %3643 = vmatmul.mubr.msk.bf16.vlgmr.msra.gmra.mrb[12].mxu1 %vm47_vm0, %v1033_v40  ;;  %v3958_v39 = vld [vmem:[%s4927_s5 + $0x28] sm:$0xff]   ;;  %v3959_v40 = vld [vmem:[%s4927_s5 + $0x70] sm:$0xff]  }
 0x831   :  { %3493 = vmatpush3.bf16.msra.mxu1 %v3948_v29 }
 0x832   :  { %3494 = vmatprep.subr.bf16.mxu1 %v3949_v30 }
 0x835   :  { %3495 = vmatpush3.bf16.msra.mxu1 %v3950_v31 }
 0x836   :  { %3496 = vmatprep.subr.bf16.mxu1 %v3951_v32 }
 0x839   :  { %3497 = vmatpush3.bf16.msra.mxu1 %v3952_v33 }
 0x83a   :  { %3498 = vmatprep.subr.bf16.mxu1 %v3953_v34 }
 0x83d   :  { %3499 = vmatpush3.bf16.msra.mxu1 %v3954_v35 }
 0x83e   :  { %3500 = vmatprep.subr.bf16.mxu1 %v3955_v36 }
 0x841   :  { %3501 = vmatpush3.bf16.msra.mxu1 %v3956_v37 }
 0x842   :  { %3502 = vmatprep.subr.bf16.mxu1 %v3957_v38 }
 0x845   :  { %3503 = vmatpush3.bf16.msra.mxu1 %v3958_v39 }
 0x846   :  { %3504 = vmatprep.subr.bf16.mxu1 %v3959_v40 }
 0x903   :  { %v1095_v41 = vpop.f32.mrb[12].mxu1 }
 0x904   :  { %v1102_v46 = vadd.f32 %v1095_v41, %v4229_v0  ;;  %v3644_v45 = vpop.f32.mrb[13].mxu1  ;;  %v3960_v41 = vld [vmem:[%s4927_s5 + $0x30] sm:$0xff]  }
 0x905   :  { %v1098_v47 = vpop.f32.mrb[14].mxu1  ;;  %3505 = vmatpush3.bf16.msra.mxu1 %v3960_v41  ;;  %v1169_v45 = vld [vmem:[%s4931_s9] sm:$0x3] }
 0x906   :  { %v4418_v48 = vadd.f32 %v3264_v43, %v1102_v46  ;;  %v1103_v49 = vadd.f32 %v1098_v47, %v4234_v1  ;;  %v3645_v50 = vpop.f32.mrb[15].mxu1  ;;  %v3962_v46 = vld [vmem:[%s4927_s5 + $0x38] sm:$0xff]   ;;  %v1174_v47 = vrot.slane %v1169_v45, %v4276_v42 }
 0x908   :  { %v4421_v51 = vadd.f32 %v3264_v43, %v1103_v49  ;;  %v1118_v57 = vsel %vm47_vm0, %v4418_v48, 0.0  ;;  %v3961_v43 = vld [vmem:[%s4927_s5 + $0x78] sm:$0xff]   ;;  %v1178_v49 = vrot.slane %v1169_v45, %v4281_v44 }
 0x909   :  { %1119 = vadd.xlane.f32.xlu0 %v1118_v57  ;;  %3506 = vmatprep.subr.bf16.mxu1 %v3961_v43 }
 0x90a   :  { %v1121_v52 = vsel %vm47_vm0, %v4421_v51, 0.0  ;;  %3507 = vmatpush3.bf16.msra.mxu1 %v3962_v46 }
 0x90b   :  { %1122 = vadd.xlane.f32.xlu1 %v1121_v52 }
 0x996   :  { %v1120_v53 = vpop.xlane.xlu0 %1119 }
 0x997   :  { %v1124_v54 = vmul.f32 0.015625, %v1120_v53 }
 0x998   :  { %v1123_v0 = vpop.xlane.xlu1 %1122 }
 0x999   :  { %v1126_v55 = vsub.f32 %v4418_v48, %v1124_v54  ;;  %v1125_v56 = vmul.f32 0.015625, %v1123_v0 }
 0x99b   :  { %v1127_v58 = vsub.f32 %v4421_v51, %v1125_v56  ;;  %v1128_v1 = vmul.f32 %v1126_v55, %v1126_v55 }
 0x99d   :  { %v1130_v59 = vsel %vm47_vm0, %v1128_v1, 0.0  ;;  %v1129_v60 = vmul.f32 %v1127_v58, %v1127_v58 }
 0x99e   :  { %1131 = vadd.xlane.f32.xlu0 %v1130_v59 }
 0x99f   :  { %v1133_v62 = vsel %vm47_vm0, %v1129_v60, 0.0 }
 0x9a2   :  { %1134 = vadd.xlane.f32.xlu0 %v1133_v62 }
 0xa2b   :  { %v1132_v11 = vpop.xlane.xlu0 %1131 }
 0xa2c   :  { %v1136_v12 = vmul.f32 0.015625, %v1132_v11 }
 0xa2e   :  { %v1138_v14 = vadd.f32 1e-05, %v1136_v12 }
 0xa2f   :  { %v1135_v15 = vpop.xlane.xlu0 %1134 }
 0xa30   :  { %4047 = vrsqrt.f32 %v1138_v14  ;;  %v1137_v3 = vmul.f32 0.015625, %v1135_v15 }
 0xa32   :  { %v1139_v16 = vadd.f32 1e-05, %v1137_v3 }
 0xa34   :  { %4049 = vrsqrt.f32 %v1139_v16 }
 0xa3a   :  { %v4048_v63 = vpop.eup %4047 }
 0xa3b   :  { %v1142_v17 = vmul.f32 %v4048_v63, %v1126_v55 }
 0xa3d   :  { %v1150_v20 = vmul.f32 %v3267_v18, %v1142_v17 }
 0xa3e   :  { %v4050_v19 = vpop.eup %4049 }
 0xa3f   :  { %v1143_v21 = vmul.f32 %v4050_v19, %v1127_v58  ;;  %v1158_v25 = vadd.f32 %v3268_v23, %v1150_v20 }
 0xa41   :  { %v1151_v24 = vmul.f32 %v3267_v18, %v1143_v21 }
 0xa43   :  { %v1159_v26 = vadd.f32 %v3268_v23, %v1151_v24 }
 0xa45   :  { %v1168_v27 = vpack.c.bf16 %v1159_v26, %v1158_v25 }
 0xa47   :  { %3277 = vmatmul.mubr.msk.bf16.vlgmr.msra.gmra.mrb[8].mxu0 %vm47_vm0, %v1168_v27 }
 0xa48   :  { %1702 = vmatprep.mubr.bf16.mxu0 %v4153_v22 }
 0xb1a   :  { %v1258_v50 = vpop.f32.mrb[8].mxu0 }
 0xb1b   :  { %v4516_v57 = vadd.f32 %v1258_v50, %v1174_v47  ;;  %v1260_v52 = vpop.f32.mrb[9].mxu0 }
 0xb1c   :  { %v4518_v53 = vadd.f32 %v1260_v52, %v1178_v49  ;;  %v1262_v54 = vpop.f32.mrb[10].mxu0 }
 0xb1d   :  { %v4521_v0 = vmul.f32 0.70710677, %v4516_v57  ;;  %v4523_v55 = vadd.f32 %v1262_v54, %v1174_v47  ;;  %v1264_v56 = vpop.f32.mrb[11].mxu0 }
 0xb1e   :  { %v4526_v58 = vmul.f32 0.70710677, %v4518_v53  ;;  %v4528_v1 = vadd.f32 %v1264_v56, %v1178_v49 }
 0xb1f   :  { %v1275_v59 = vand.u32 2147483647, %v4521_v0  ;;  %v4532_v60 = vmul.f32 0.70710677, %v4523_v55  ;;  %vm1355_vm6 = vcmp.lt.f32.partialorder %v4521_v0, 0.0 }
 0xb20   :  { %v1276_v62 = vand.u32 2147483647, %v4526_v58  ;;  %v4536_v2 = vmul.f32 0.70710677, %v4528_v1  ;;  %vm1356_vm7 = vcmp.lt.f32.partialorder %v4526_v58, 0.0 }
 0xb21   :  { %v1279_v4 = vmul.f32 0.3275911, %v1275_v59  ;;  %v1277_v5 = vand.u32 2147483647, %v4532_v60  ;;  %v1331_v15 = vsub.f32 0.0, %v1275_v59  ;;  %vm1357_vm8 = vcmp.lt.f32.partialorder %v4532_v60, 0.0 }
 0xb22   :  { %v1280_v6 = vmul.f32 0.3275911, %v1276_v62  ;;  %v1278_v7 = vand.u32 2147483647, %v4536_v2  ;;  %v1332_v3 = vsub.f32 0.0, %v1276_v62  ;;  %vm1358_vm9 = vcmp.lt.f32.partialorder %v4536_v2, 0.0 }
 0xb23   :  { %v1283_v8 = vadd.f32 1.0, %v1279_v4  ;;  %v1281_v9 = vmul.f32 0.3275911, %v1277_v5  ;;  %v1335_v63 = vmul.f32 %v1331_v15, %v1275_v59  ;;  %v1333_v17 = vsub.f32 0.0, %v1277_v5 }
 0xb24   :  { %v1284_v10 = vadd.f32 1.0, %v1280_v6  ;;  %v1282_v11 = vmul.f32 0.3275911, %v1278_v7  ;;  %v1336_v20 = vmul.f32 %v1332_v3, %v1276_v62  ;;  %v1334_v23 = vsub.f32 0.0, %v1278_v7 }
 0xb25   :  { %4051 = vrcp.f32 %v1283_v8  ;;  %v1285_v12 = vadd.f32 1.0, %v1281_v9  ;;  %v1339_v26 = vmul.f32 1.442695, %v1335_v63  ;;  %v1337_v28 = vmul.f32 %v1333_v17, %v1277_v5 }
 0xb26   :  { %4053 = vrcp.f32 %v1284_v10  ;;  %v1286_v14 = vadd.f32 1.0, %v1282_v11  ;;  %v1341_v30 = vmul.f32 1.442695, %v1336_v20  ;;  %v1338_v34 = vmul.f32 %v1334_v23, %v1278_v7 }
 0xb27   :  { %4055 = vrcp.f32 %v1285_v12  ;;  %v1343_v39 = vmul.f32 1.442695, %v1337_v28 }
 0xb28   :  { %4057 = vrcp.f32 %v1286_v14  ;;  %v1345_v45 = vmul.f32 1.442695, %v1338_v34 }
 0xb29   :  { %4059 = vpow2.f32 %v1339_v26 }
 0xb2a   :  { %4061 = vpow2.f32 %v1341_v30 }
 0xb2b   :  { %4063 = vpow2.f32 %v1343_v39  ;;  %v1269_v39 = vmul.f32 0.5, %v4523_v55 }
 0xb2c   :  { %4065 = vpow2.f32 %v1345_v45 }
 0xb2f   :  { %v4052_v16 = vpop.eup %4051 }
 0xb30   :  { %v4054_v18 = vpop.eup %4053  ;;  %v1295_v19 = vmul.f32 1.0614054, %v4052_v16 }
 0xb31   :  { %v1296_v21 = vmul.f32 1.0614054, %v4054_v18  ;;  %v4056_v25 = vpop.eup %4055 }
 0xb32   :  { %v3278_v24 = vadd.f32 -1.4531521, %v1295_v19  ;;  %v1297_v31 = vmul.f32 1.0614054, %v4056_v25  ;;  %v4058_v32 = vpop.eup %4057 }
 0xb33   :  { %v3279_v27 = vadd.f32 -1.4531521, %v1296_v21  ;;  %v1298_v37 = vmul.f32 1.0614054, %v4058_v32  ;;  %v4060_v11 = vpop.eup %4059 }
 0xb34   :  { %v1303_v29 = vmul.f32 %v4052_v16, %v3278_v24  ;;  %v3280_v36 = vadd.f32 -1.4531521, %v1297_v31  ;;  %v4062_v14 = vpop.eup %4061 }
 0xb35   :  { %v1304_v33 = vmul.f32 %v4054_v18, %v3279_v27  ;;  %v3281_v43 = vadd.f32 -1.4531521, %v1298_v37  ;;  %v4064_v23 = vpop.eup %4063 }
 0xb36   :  { %v1307_v35 = vadd.f32 1.4214138, %v1303_v29  ;;  %v1305_v41 = vmul.f32 %v4056_v25, %v3280_v36  ;;  %v4066_v29 = vpop.eup %4065 }
 0xb37   :  { %v1308_v38 = vadd.f32 1.4214138, %v1304_v33  ;;  %v1306_v50 = vmul.f32 %v4058_v32, %v3281_v43 }
 0xb38   :  { %v1311_v40 = vmul.f32 %v4052_v16, %v1307_v35  ;;  %v1309_v49 = vadd.f32 1.4214138, %v1305_v41 }
 0xb39   :  { %v1312_v46 = vmul.f32 %v4054_v18, %v1308_v38  ;;  %v1310_v59 = vadd.f32 1.4214138, %v1306_v50 }
 0xb3a   :  { %v3282_v47 = vadd.f32 -0.28449672, %v1311_v40  ;;  %v1313_v56 = vmul.f32 %v4056_v25, %v1309_v49  ;;  %v1268_v40 = vmul.f32 0.5, %v4518_v53  ;;  %v3303_v53 = vld [vmem:[%s4929_s7 + $0x5] ss:$0 sm:$0xff] }
 0xb3b   :  { %v3283_v52 = vadd.f32 -0.28449672, %v1312_v46  ;;  %v1314_v6 = vmul.f32 %v4058_v32, %v1310_v59  ;;  %v1270_v46 = vmul.f32 0.5, %v4528_v1 }
 0xb3c   :  { %v1319_v54 = vmul.f32 %v4052_v16, %v3282_v47  ;;  %v3284_v5 = vadd.f32 -0.28449672, %v1313_v56 }
 0xb3d   :  { %v1320_v62 = vmul.f32 %v4054_v18, %v3283_v52  ;;  %v3285_v10 = vadd.f32 -0.28449672, %v1314_v6 }
 0xb3e   :  { %v1323_v4 = vadd.f32 0.2548296, %v1319_v54  ;;  %v1321_v9 = vmul.f32 %v4056_v25, %v3284_v5 }
 0xb3f   :  { %v1324_v7 = vadd.f32 0.2548296, %v1320_v62  ;;  %v1322_v63 = vmul.f32 %v4058_v32, %v3285_v10 }
 0xb40   :  { %v1327_v8 = vmul.f32 %v4052_v16, %v1323_v4  ;;  %v1325_v3 = vadd.f32 0.2548296, %v1321_v9 }
 0xb41   :  { %v1328_v12 = vmul.f32 %v4054_v18, %v1324_v7  ;;  %v1326_v21 = vadd.f32 0.2548296, %v1322_v63  ;;  %v3963_v63 = vld [vmem:[%s4924_s2 + $0x40] ss:$8 sps:$4 sm:$0xff]  }
 0xb42   :  { %v1347_v15 = vmul.f32 %v4060_v11, %v1327_v8  ;;  %v1329_v20 = vmul.f32 %v4056_v25, %v1325_v3  ;;  %v1267_v25 = vmul.f32 0.5, %v4516_v57  ;;  %v3965_v3 = vld [vmem:[%s4924_s2 + $0x44] ss:$8 sps:$4 sm:$0xff]  }
 0xb43   :  { %v1348_v17 = vmul.f32 %v4062_v14, %v1328_v12  ;;  %v1330_v28 = vmul.f32 %v4058_v32, %v1326_v21  ;;  %1670 = vmatprep.subr.bf16.mxu0 %v3965_v3  ;;  %v3969_v21 = vld [vmem:[%s4924_s2 + $0x60] ss:$8 sps:$4 sm:$0xff]  }
 0xb44   :  { %v1351_v19 = vsub.f32 1.0, %v1347_v15  ;;  %v1349_v27 = vmul.f32 %v4064_v23, %v1329_v20  ;;  %1671 = vmatpush1.bf16.msra.mxu0 %v3963_v63  ;;  %v3971_v20 = vld [vmem:[%s4924_s2 + $0x64] ss:$8 sps:$4 sm:$0xff]   ;;  %v3972_v23 = vld [vmem:[%s4924_s2 + $0x70] ss:$8 sps:$4 sm:$0xff]  }
 0xb45   :  { %v1352_v24 = vsub.f32 1.0, %v1348_v17  ;;  %v1350_v18 = vmul.f32 %v4066_v29, %v1330_v28  ;;  %v3968_v17 = vld [vmem:[%s4924_s2 + $0x54] ss:$8 sps:$4 sm:$0xff]  }
 0xb46   :  { %v1359_v26 = vsub.f32 0.0, %v1351_v19  ;;  %v1353_v31 = vsub.f32 1.0, %v1349_v27  ;;  %1672 = vmatprep.subr.bf16.mxu0 %v3968_v17 }
 0xb47   :  { %v1360_v16 = vsub.f32 0.0, %v1352_v24  ;;  %v1354_v35 = vsub.f32 1.0, %v1350_v18  ;;  %v3306_v18 = vld [vmem:[%s4929_s7 + $0x6] ss:$0 sm:$0xff] }
 0xb48   :  { %v1363_v30 = vsel %vm1355_vm6, %v1359_v26, %v1351_v19  ;;  %v1361_v34 = vsub.f32 0.0, %v1353_v31  ;;  %v3966_v19 = vld [vmem:[%s4924_s2 + $0x50] ss:$8 sps:$4 sm:$0xff]  }
 0xb49   :  { %v1364_v33 = vsel %vm1356_vm7, %v1360_v16, %v1352_v24  ;;  %v1367_v36 = vadd.f32 1.0, %v1363_v30  ;;  %v1362_v38 = vsub.f32 0.0, %v1354_v35  ;;  %1673 = vmatpush1.bf16.msra.mxu0 %v3966_v19  ;;  %v3974_v24 = vld [vmem:[%s4924_s2 + $0x74] ss:$8 sps:$4 sm:$0xff]  }
 0xb4a   :  { %v1365_v37 = vsel %vm1357_vm8, %v1361_v34, %v1353_v31  ;;  %v1368_v32 = vadd.f32 1.0, %v1364_v33  ;;  %1674 = vmatprep.subr.bf16.mxu0 %v3971_v20 }
 0xb4b   :  { %v1369_v0 = vadd.f32 1.0, %v1365_v37  ;;  %v1366_v41 = vsel %vm1358_vm9, %v1362_v38, %v1354_v35  ;;  %v1371_v58 = vmul.f32 %v1367_v36, %v1267_v25  ;;  %v3307_v25 = vld [vmem:[%s4929_s7 + $0x7] ss:$0 sm:$0xff] }
 0xb4c   :  { %v1370_v45 = vadd.f32 1.0, %v1366_v41  ;;  %v1372_v47 = vmul.f32 %v1368_v32, %v1268_v40 }
 0xb4d   :  { %v1373_v43 = vmul.f32 %v1369_v0, %v1269_v39  ;;  %1675 = vmatpush1.bf16.msra.mxu0 %v3969_v21  ;;  %v3316_v0 = vld [vmem:[%s4930_s8 + $0x2] sm:$0x3] }
 0xb4e   :  { %v1374_v49 = vmul.f32 %v1370_v45, %v1270_v46  ;;  %1676 = vmatprep.subr.bf16.mxu0 %v3974_v24  ;;  %v1620_v40 = vrot.slane %v3316_v0, %v4276_v42 }
 0xb4f   :  { %v1407_v60 = vpack.c.bf16 %v1373_v43, %v1371_v58  ;;  %v1624_v58 = vrot.slane %v3316_v0, %v4281_v44 }
 0xb50   :  { %v1408_v57 = vpack.c.bf16 %v1374_v49, %v1372_v47 }
 0xb51   :  { %1677 = vmatpush1.bf16.msra.mxu0 %v3972_v23 }
 0xb52   :  { %1537 = vmatprep.mubr.bf16.mxu1 %v1408_v57 }
 0xb53   :  { %1538 = vmatmul.mubr.bf16.vlgmr.msra.gmra.mrb[16].mxu1 %v1407_v60 }
 0xc26   :  { %v3508_v50 = vpop.f32.mrb[16].mxu1 }
 0xc27   :  { %v3509_v52 = vpop.f32.mrb[17].mxu1 }
 0xc28   :  { %v3510_v55 = vadd.f32 %v3509_v52, %v3508_v50  ;;  %v3511_v54 = vpop.f32.mrb[18].mxu1 }
 0xc29   :  { %v3512_v2 = vpop.f32.mrb[19].mxu1 }
 0xc2a   :  { %v1546_v56 = vadd.f32 %v3510_v55, %v4418_v48  ;;  %v3513_v59 = vadd.f32 %v3512_v2, %v3511_v54 }
 0xc2c   :  { %v4552_v1 = vadd.f32 %v3303_v53, %v1546_v56  ;;  %v1547_v62 = vadd.f32 %v3513_v59, %v4421_v51 }
 0xc2e   :  { %v4555_v4 = vadd.f32 %v3303_v53, %v1547_v62  ;;  %v1562_v5 = vsel %vm47_vm0, %v4552_v1, 0.0 }
 0xc2f   :  { %1563 = vadd.xlane.f32.xlu0 %v1562_v5  ;;  %v4632_v5 = vld [vmem:[%s4923_s1] sm:$0xff] }
 0xc30   :  { %v1565_v6 = vsel %vm47_vm0, %v4555_v4, 0.0 }
 0xc31   :  { %1566 = vadd.xlane.f32.xlu1 %v1565_v6 }
 0xcbc   :  { %v1564_v7 = vpop.xlane.xlu0 %1563 }
 0xcbd   :  { %v1568_v8 = vmul.f32 0.015625, %v1564_v7  ;;  %v4638_v7 = vld [vmem:[%s4923_s1 + $0x8] sm:$0xff] }
 0xcbe   :  { %v1567_v9 = vpop.xlane.xlu1 %1566 }
 0xcbf   :  { %v1570_v48 = vsub.f32 %v4552_v1, %v1568_v8  ;;  %v1569_v10 = vmul.f32 0.015625, %v1567_v9 }
 0xcc1   :  { %v1571_v11 = vsub.f32 %v4555_v4, %v1569_v10  ;;  %v1572_v12 = vmul.f32 %v1570_v48, %v1570_v48 }
 0xcc3   :  { %v1574_v51 = vsel %vm47_vm0, %v1572_v12, 0.0  ;;  %v1573_v14 = vmul.f32 %v1571_v11, %v1571_v11 }
 0xcc4   :  { %1575 = vadd.xlane.f32.xlu0 %v1574_v51 }
 0xcc5   :  { %v1577_v15 = vsel %vm47_vm0, %v1573_v14, 0.0 }
 0xcc6   :  { %1578 = vadd.xlane.f32.xlu1 %v1577_v15 }
 0xd51   :  { %v1576_v26 = vpop.xlane.xlu0 %1575 }
 0xd52   :  { %v1580_v27 = vmul.f32 0.015625, %v1576_v26 }
 0xd53   :  { %v1579_v28 = vpop.xlane.xlu1 %1578 }
 0xd54   :  { %v1582_v29 = vadd.f32 1e-05, %v1580_v27  ;;  %v1581_v16 = vmul.f32 0.015625, %v1579_v28 }
 0xd56   :  { %4067 = vrsqrt.f32 %v1582_v29  ;;  %v1583_v30 = vadd.f32 1e-05, %v1581_v16 }
 0xd58   :  { %4069 = vrsqrt.f32 %v1583_v30 }
 0xd60   :  { %v4068_v31 = vpop.eup %4067 }
 0xd61   :  { %v1586_v33 = vmul.f32 %v4068_v31, %v1570_v48 }
 0xd62   :  { %v4070_v34 = vpop.eup %4069 }
 0xd63   :  { %v1594_v35 = vmul.f32 %v3306_v18, %v1586_v33  ;;  %v1587_v36 = vmul.f32 %v4070_v34, %v1571_v11 }
 0xd65   :  { %v1595_v37 = vmul.f32 %v3306_v18, %v1587_v36  ;;  %v1602_v38 = vadd.f32 %v3307_v25, %v1594_v35 }
 0xd67   :  { %v1603_v32 = vadd.f32 %v3307_v25, %v1595_v37 }
 0xd69   :  { %v1613_v39 = vpack.c.bf16 %v1603_v32, %v1602_v38 }
 0xd6b   :  { %3325 = vmatmul.mubr.msk.bf16.vlgmr.msra.gmra.mrb[12].mxu0 %vm47_vm0, %v1613_v39 }
 0xe3e   :  { %v1704_v41 = vpop.f32.mrb[12].mxu0 }
 0xe3f   :  { %v4601_v43 = vadd.f32 %v1704_v41, %v1620_v40  ;;  %v1706_v46 = vpop.f32.mrb[13].mxu0 }
 0xe40   :  { %v1708_v45 = vpop.f32.mrb[14].mxu0  ;;  %v1707_v49 = vadd.f32 %v1706_v46, %v1624_v58 }
 0xe41   :  { %v4603_v47 = vadd.f32 %v1708_v45, %v1620_v40  ;;  %v1710_v60 = vpop.f32.mrb[15].mxu0  ;;  %3650 = vmatprep.mubr.msk.f32.mxu0 %vm204_vm1, %v4601_v43 }
 0xe42   :  { %v1711_v57 = vadd.f32 %v1710_v60, %v1624_v58 }
 0xe43   :  { %v4609_v50 = vpack.i.bf16 %v4603_v47, %v4601_v43 }
 0xe44   :  { %v3772_v52 = vpack.c.bf16 %v1711_v57, %v1707_v49  ;;  %v4611_v55 = vpack.i.bf16 %v1711_v57, %v1707_v49 }
 0xe45   :  { %3870 = vrot.lane.b32.xlu0 %v4609_v50, %s4154_s22 }
 0xe49   :  { %1905 = vrot.lane.b32.xlu0 %v4601_v43, %s4156_s24 }
 0xe4d   :  { %3880 = vrot.lane.b32.xlu0 %v4609_v50, %s4155_s23 }
 0xe51   :  { %1907 = vrot.lane.b32.xlu0 %v4603_v47, %s4156_s24 }
 0xe55   :  { %2109 = vrot.lane.b32.xlu0 %v4603_v47, %s4157_s25 }
 0xeb7   :  { %v3871_v54 = vpop.permute.xlu0 %3870 }
 0xeb8   :  { %v3873_v53 = vunpack.i.h.bf16 %v3871_v54  ;;  %v3872_v2 = vunpack.i.l.bf16 %v3871_v54 }
 0xeba   :  { %v3766_v56 = vpack.c.bf16 %v3873_v53, %v3872_v2 }
 0xebb   :  { %v1906_v23 = vpop.permute.xlu0 %1905 }
 0xebc   :  { %3768 = vmatprep.subr.msk.bf16.mxu0 %vm4296_vm2, %v3766_v56 }
 0xebd   :  { %3771 = vmatpush3.bf16.xpose.msk.msra.mxu0 %vm4296_vm2, %v3766_v56 }
 0xebe   :  { %3773 = vmatprep.subr.bf16.mxu0 %v3772_v52 }
 0xebf   :  { %v3881_v29 = vpop.permute.xlu0 %3880 }
 0xec0   :  { %v3883_v31 = vunpack.i.h.bf16 %v3881_v29  ;;  %v3882_v18 = vunpack.i.l.bf16 %v3881_v29 }
 0xec2   :  { %v3786_v35 = vpack.c.bf16 %v3883_v31, %v3882_v18 }
 0xec3   :  { %v1908_v36 = vpop.permute.xlu0 %1907 }
 0xec4   :  { %3651 = vmatmul.mubr.msk.f32.vlgmr.msra.gmra.mrb[16].mxu0 %vm204_vm1, %v4603_v47 }
 0xec5   :  { %3775 = vmatpush3.bf16.msra.mxu0 %v3772_v52 }
 0xec7   :  { %v2110_v37 = vpop.permute.xlu0 %2109 }
 0xf97   :  { %v3652_v59 = vpop.f32.mrb[16].mxu0 }
 0xf98   :  { %v1793_v62 = vpop.f32.mrb[17].mxu0  ;;  %v1799_v8 = vadd.f32 %v4638_v7, %v3652_v59 }
 0xf99   :  { %v1794_v6 = vadd.f32 %v4632_v5, %v1793_v62 }
 0xf9a   :  { %v1805_v48 = vsel %vm204_vm1, %v1799_v8, -inf }
 0xf9b   :  { %v1802_v9 = vsel %vm204_vm1, %v1794_v6, -inf }
 0xf9c   :  { %1803 = vmax.xlane.f32.xlu1 %v1802_v9 }
 0xfa0   :  { %1806 = vmax.xlane.f32.xlu1 %v1805_v48 }
0x1029   :  { %v1804_v10 = vpop.xlane.xlu1 %1803 }
0x102a   :  { %v1808_v11 = vsub.f32 %v1794_v6, %v1804_v10 }
0x102c   :  { %v1810_v14 = vmul.f32 1.442695, %v1808_v11 }
0x102d   :  { %v1807_v12 = vpop.xlane.xlu1 %1806 }
0x102e   :  { %v1809_v51 = vsub.f32 %v1799_v8, %v1807_v12 }
0x1030   :  { %v1812_v15 = vmul.f32 1.442695, %v1809_v51 }
0x1032   :  { %4071 = vpow2.f32 %v1812_v15 }
0x1033   :  { %4073 = vpow2.f32 %v1810_v14 }
0x103c   :  { %v4072_v3 = vpop.eup %4071 }
0x103d   :  { %v1817_v63 = vsel %vm204_vm1, %v4072_v3, 0.0  ;;  %v4074_v17 = vpop.eup %4073 }
0x103e   :  { %1818 = vadd.xlane.f32.xlu1 %v1817_v63  ;;  %v1814_v19 = vsel %vm204_vm1, %v4074_v17, 0.0 }
0x1042   :  { %1815 = vadd.xlane.f32.xlu1 %v1814_v19 }
0x1053   :  { %3875 = vrot.lane.b32.xlu1 %v4609_v50, %s4159_s12 }
0x1057   :  { %2107 = vrot.lane.b32.xlu1 %v4601_v43, %s4157_s25 }
0x10cb   :  { %v1819_v20 = vpop.xlane.xlu1 %1818 }
0x10cc   :  { %4075 = vrcp.f32 %v1819_v20 }
0x10cf   :  { %v1816_v21 = vpop.xlane.xlu1 %1815 }
0x10d0   :  { %4077 = vrcp.f32 %v1816_v21 }
0x10d3   :  { %v3876_v24 = vpop.permute.xlu1 %3875 }
0x10d4   :  { %v3878_v26 = vunpack.i.h.bf16 %v3876_v24  ;;  %v3877_v27 = vunpack.i.l.bf16 %v3876_v24 }
0x10d6   :  { %v3776_v28 = vpack.c.bf16 %v3878_v26, %v3877_v27  ;;  %v4076_v16 = vpop.eup %4075 }
0x10d7   :  { %v1823_v34 = vmul.f32 %v4076_v16, %v4072_v3  ;;  %v2108_v25 = vpop.permute.xlu1 %2107 }
0x10d8   :  { %3778 = vmatprep.subr.msk.bf16.mxu0 %vm4296_vm2, %v3776_v28 }
0x10da   :  { %v4078_v30 = vpop.eup %4077 }
0x10db   :  { %v1822_v33 = vmul.f32 %v4078_v30, %v4074_v17 }
0x10dd   :  { %3657 = vmatprep.mubr.msk.f32.mxu0 %vm204_vm1, %v1822_v33 }
0x10de   :  { %3658 = vmatmul.mubr.msk.f32.vlgmr.msra.gmra.mrb[18].mxu0 %vm204_vm1, %v1823_v34 }
0x10df   :  { %3781 = vmatpush3.bf16.xpose.msk.msra.mxu0 %vm4296_vm2, %v3776_v28  ;;  %3664 = vmatprep.mubr.msk.f32.mxu0 %vm204_vm1, %v1906_v23 }
0x10e0   :  { %3788 = vmatprep.subr.msk.bf16.mxu0 %vm4296_vm2, %v3786_v35 }
0x10e6   :  { %3665 = vmatmul.mubr.msk.f32.vlgmr.msra.gmra.mrb[20].mxu0 %vm204_vm1, %v1908_v36 }
0x10e7   :  { %3791 = vmatpush3.bf16.xpose.msk.msra.mxu0 %vm4296_vm2, %v3786_v35  ;;  %3678 = vmatprep.mubr.msk.f32.mxu0 %vm204_vm1, %v2108_v25 }
0x10ee   :  { %3679 = vmatmul.mubr.msk.f32.vlgmr.msra.gmra.mrb[22].mxu0 %vm204_vm1, %v2110_v37 }
0x11b1   :  { %v4663_v38 = vpop.f32.mrb[18].mxu0 }
0x11b2   :  { %v4665_v32 = vpop.f32.mrb[19].mxu0 }
0x11b9   :  { %v3666_v39 = vpop.f32.mrb[20].mxu0 }
0x11ba   :  { %v1993_v0 = vadd.f32 %v4638_v7, %v3666_v39  ;;  %v1987_v40 = vpop.f32.mrb[21].mxu0 }
0x11bb   :  { %v1988_v41 = vadd.f32 %v4632_v5, %v1987_v40 }
0x11bc   :  { %v1999_v58 = vsel %vm204_vm1, %v1993_v0, -inf }
0x11bd   :  { %2000 = vmax.xlane.f32.xlu0 %v1999_v58  ;;  %v1996_v46 = vsel %vm204_vm1, %v1988_v41, -inf }
0x11be   :  { %1997 = vmax.xlane.f32.xlu1 %v1996_v46 }
0x11c1   :  { %v3680_v45 = vpop.f32.mrb[22].mxu0 }
0x11c2   :  { %v2189_v60 = vpop.f32.mrb[23].mxu0  ;;  %v2195_v57 = vadd.f32 %v4638_v7, %v3680_v45 }
0x11c3   :  { %v2190_v49 = vadd.f32 %v4632_v5, %v2189_v60 }
0x11c4   :  { %v2201_v54 = vsel %vm204_vm1, %v2195_v57, -inf }
0x11c5   :  { %v2198_v52 = vsel %vm204_vm1, %v2190_v49, -inf }
0x11c6   :  { %2199 = vmax.xlane.f32.xlu0 %v2198_v52 }
0x11ca   :  { %2202 = vmax.xlane.f32.xlu0 %v2201_v54 }
0x11cf   :  { %3885 = vrot.lane.b32.xlu1 %v4611_v55, %s4156_s24 }
0x124a   :  { %v2001_v53 = vpop.xlane.xlu0 %2000 }
0x124b   :  { %v2003_v2 = vsub.f32 %v1993_v0, %v2001_v53  ;;  %v1998_v56 = vpop.xlane.xlu1 %1997 }
0x124c   :  { %v2002_v59 = vsub.f32 %v1988_v41, %v1998_v56 }
0x124d   :  { %v2006_v62 = vmul.f32 1.442695, %v2003_v2 }
0x124e   :  { %v2004_v6 = vmul.f32 1.442695, %v2002_v59 }
0x124f   :  { %4079 = vpow2.f32 %v2006_v62  ;;  %v3886_v8 = vpop.permute.xlu1 %3885 }
0x1250   :  { %4081 = vpow2.f32 %v2004_v6  ;;  %v3888_v9 = vunpack.i.h.bf16 %v3886_v8  ;;  %v3887_v48 = vunpack.i.l.bf16 %v3886_v8 }
0x1252   :  { %v3782_v10 = vpack.c.bf16 %v3888_v9, %v3887_v48 }
0x1253   :  { %v2200_v11 = vpop.xlane.xlu0 %2199 }
0x1254   :  { %3783 = vmatprep.subr.bf16.mxu1 %v3782_v10  ;;  %v2204_v21 = vsub.f32 %v2190_v49, %v2200_v11 }
0x1255   :  { %3785 = vmatpush3.bf16.msra.mxu1 %v3782_v10 }
0x1256   :  { %v2206_v23 = vmul.f32 1.442695, %v2204_v21 }
0x1257   :  { %v2203_v12 = vpop.xlane.xlu0 %2202 }
0x1258   :  { %v2205_v51 = vsub.f32 %v2195_v57, %v2203_v12 }
0x1259   :  { %v4080_v14 = vpop.eup %4079 }
0x125a   :  { %v4082_v15 = vpop.eup %4081  ;;  %v2208_v3 = vmul.f32 1.442695, %v2205_v51  ;;  %v2011_v63 = vsel %vm204_vm1, %v4080_v14, 0.0 }
0x125b   :  { %2012 = vadd.xlane.f32.xlu0 %v2011_v63  ;;  %v2008_v17 = vsel %vm204_vm1, %v4082_v15, 0.0 }
0x125c   :  { %4083 = vpow2.f32 %v2208_v3  ;;  %2009 = vadd.xlane.f32.xlu1 %v2008_v17 }
0x125d   :  { %4085 = vpow2.f32 %v2206_v23 }
0x1266   :  { %v4084_v19 = vpop.eup %4083 }
0x1267   :  { %v2213_v20 = vsel %vm204_vm1, %v4084_v19, 0.0  ;;  %v4086_v24 = vpop.eup %4085 }
0x1268   :  { %2214 = vadd.xlane.f32.xlu0 %v2213_v20  ;;  %v2210_v26 = vsel %vm204_vm1, %v4086_v24, 0.0 }
0x126d   :  { %3895 = vrot.lane.b32.xlu1 %v4609_v50, %s4160_s13 }
0x1271   :  { %2307 = vrot.lane.b32.xlu1 %v4601_v43, %s4158_s26 }
0x127e   :  { %3890 = vrot.lane.b32.xlu0 %v4611_v55, %s4157_s25  ;;  %s4163_s25 = smov [#allocation2]  }
0x1295   :  { %2211 = vadd.xlane.f32.xlu1 %v2210_v26  ;;  %v3977_v26 = vld [vmem:[%s4925_s3 + $0x30] sm:$0xff]  }
0x12a6   :  { %2309 = vrot.lane.b32.xlu1 %v4603_v47, %s4158_s26 }
0x12e8   :  { %v2013_v27 = vpop.xlane.xlu0 %2012 }
0x12e9   :  { %4087 = vrcp.f32 %v2013_v27  ;;  %v2010_v28 = vpop.xlane.xlu1 %2009  ;;  %v3978_v27 = vld [vmem:[%s4925_s3 + $0x38] sm:$0xff]  }
0x12ea   :  { %4089 = vrcp.f32 %v2010_v28 }
0x12ed   :  { %v3896_v31 = vpop.permute.xlu1 %3895 }
0x12ee   :  { %v3898_v33 = vunpack.i.h.bf16 %v3896_v31  ;;  %v3897_v34 = vunpack.i.l.bf16 %v3896_v31 }
0x12f0   :  { %v3796_v25 = vpack.c.bf16 %v3898_v33, %v3897_v34 }
0x12f1   :  { %v2308_v37 = vpop.permute.xlu1 %2307 }
0x12f3   :  { %v4088_v50 = vpop.eup %4087 }
0x12f4   :  { %v4090_v29 = vpop.eup %4089  ;;  %v2017_v30 = vmul.f32 %v4088_v50, %v4080_v14 }
0x12f5   :  { %v2215_v43 = vpop.xlane.xlu0 %2214  ;;  %v2016_v16 = vmul.f32 %v4090_v29, %v4082_v15 }
0x12f6   :  { %4091 = vrcp.f32 %v2215_v43 }
0x12f7   :  { %3671 = vmatprep.mubr.msk.f32.mxu1 %vm204_vm1, %v2016_v16 }
0x12f8   :  { %3672 = vmatmul.mubr.msk.f32.vlgmr.msra.gmra.mrb[20].mxu1 %vm204_vm1, %v2017_v30 }
0x12f9   :  { %v3891_v18 = vpop.permute.xlu0 %3890 }
0x12fa   :  { %v3893_v35 = vunpack.i.h.bf16 %v3891_v18  ;;  %v3892_v36 = vunpack.i.l.bf16 %v3891_v18 }
0x12fc   :  { %v3792_v47 = vpack.c.bf16 %v3893_v35, %v3892_v36 }
0x12fe   :  { %3793 = vmatprep.subr.bf16.mxu1 %v3792_v47 }
0x12ff   :  { %3795 = vmatpush3.bf16.msra.mxu1 %v3792_v47 }
0x1300   :  { %3798 = vmatprep.subr.msk.bf16.mxu1 %vm4296_vm2, %v3796_v25  ;;  %v4092_v0 = vpop.eup %4091 }
0x1301   :  { %v2219_v58 = vmul.f32 %v4092_v0, %v4084_v19 }
0x1322   :  { %v2212_v39 = vpop.xlane.xlu1 %2211 }
0x1323   :  { %4093 = vrcp.f32 %v2212_v39 }
0x1326   :  { %v2310_v46 = vpop.permute.xlu1 %2309 }
0x132d   :  { %v4094_v40 = vpop.eup %4093 }
0x132e   :  { %v2218_v41 = vmul.f32 %v4094_v40, %v4086_v24  ;;  %v3976_v24 = vld [vmem:[%s4925_s3 + $0x28] sm:$0xff]  }
0x1330   :  { %3685 = vmatprep.mubr.msk.f32.mxu1 %vm204_vm1, %v2218_v41 }
0x1331   :  { %3686 = vmatmul.mubr.msk.f32.vlgmr.msra.gmra.mrb[22].mxu1 %vm204_vm1, %v2219_v58 }
0x1332   :  { %3801 = vmatpush3.bf16.xpose.msk.msra.mxu1 %vm4296_vm2, %v3796_v25  ;;  %3692 = vmatprep.mubr.msk.f32.mxu1 %vm204_vm1, %v2308_v37 }
0x1339   :  { %3693 = vmatmul.mubr.msk.f32.vlgmr.msra.gmra.mrb[24].mxu1 %vm204_vm1, %v2310_v46 }
0x133a   :  { %2771 = vmatprep.mubr.bf16.mxu1 %v4153_v22 }
0x13cb   :  { %v3673_v45 = vpop.f32.mrb[20].mxu1 }
0x13cc   :  { %v2098_v60 = vpop.f32.mrb[21].mxu1 }
0x13cd   :  { %v3904_v49 = vpack.i.bf16 %v3673_v45, %v2098_v60 }
0x1404   :  { %v3687_v57 = vpop.f32.mrb[22].mxu1 }
0x1405   :  { %v2298_v52 = vpop.f32.mrb[23].mxu1 }
0x1406   :  { %v3909_v54 = vpack.i.bf16 %v3687_v57, %v2298_v52 }
0x140c   :  { %v3694_v53 = vpop.f32.mrb[24].mxu1 }
0x140d   :  { %v2395_v2 = vadd.f32 %v4638_v7, %v3694_v53  ;;  %v2389_v56 = vpop.f32.mrb[25].mxu1 }
0x140e   :  { %v2390_v61 = vadd.f32 %v4632_v5, %v2389_v56 }
0x140f   :  { %v2401_v59 = vsel %vm204_vm1, %v2395_v2, -inf }
0x1410   :  { %2402 = vmax.xlane.f32.xlu1 %v2401_v59  ;;  %v2398_v62 = vsel %vm204_vm1, %v2390_v61, -inf }
0x1411   :  { %2399 = vmax.xlane.f32.xlu0 %v2398_v62 }
0x1421   :  { %3905 = vrot.lane.b32.xlu1 %v3904_v49, %s4160_s13 }
0x1425   :  { %3910 = vrot.lane.b32.xlu1 %v3909_v54, %s4155_s23 }
0x149d   :  { %v2403_v22 = vpop.xlane.xlu1 %2402 }
0x149e   :  { %v2405_v6 = vsub.f32 %v2395_v2, %v2403_v22  ;;  %v2400_v8 = vpop.xlane.xlu0 %2399 }
0x149f   :  { %v2404_v9 = vsub.f32 %v2390_v61, %v2400_v8 }
0x14a0   :  { %v2408_v48 = vmul.f32 1.442695, %v2405_v6 }
0x14a1   :  { %v2406_v10 = vmul.f32 1.442695, %v2404_v9  ;;  %v3906_v43 = vpop.permute.xlu1 %3905  ;;  %v3981_v9 = vld [vmem:[%s4926_s4 + $0x44] ss:$8 sps:$4 sm:$0xff]  }
0x14a2   :  { %4095 = vpow2.f32 %v2408_v48  ;;  %v3908_v30 = vunpack.i.h.bf16 %v3906_v43  ;;  %v3907_v31 = vunpack.i.l.bf16 %v3906_v43  ;;  %v3979_v48 = vld [vmem:[%s4926_s4 + $0x40] ss:$8 sps:$4 sm:$0xff]   ;;  %2739 = vmatprep.subr.bf16.mxu1 %v3981_v9 }
0x14a3   :  { %4097 = vpow2.f32 %v2406_v10  ;;  %2740 = vmatpush1.bf16.msra.mxu1 %v3979_v48  ;;  %v3984_v10 = vld [vmem:[%s4926_s4 + $0x54] ss:$8 sps:$4 sm:$0xff]  }
0x14a4   :  { %v2532_v35 = vsel %vm204_vm1, %v4663_v38, %v3908_v30  ;;  %v2531_v36 = vsel %vm204_vm1, %v4665_v32, %v3907_v31  ;;  %v3364_v38 = vld [vmem:[%s4929_s7 + $0x8] ss:$0 sm:$0xff]  ;;  %2741 = vmatprep.subr.bf16.mxu1 %v3984_v10  ;;  %v3992_v30 = vld [vmem:[%s4927_s5 + $0x80] sm:$0xff]  }
0x14a5   :  { %v3911_v16 = vpop.permute.xlu1 %3910  ;;  %v3993_v31 = vld [vmem:[%s4927_s5 + $0xc8] sm:$0xff]  }
0x14a6   :  { %v3913_v18 = vunpack.i.h.bf16 %v3911_v16  ;;  %v3912_v33 = vunpack.i.l.bf16 %v3911_v16  ;;  %v3991_v16 = vld [vmem:[%s4927_s5 + $0xc0] sm:$0xff]  }
0x14a8   :  { %v2533_v37 = vsel %vm1019_vm4, %v2531_v36, %v3912_v33  ;;  %v2534_v39 = vsel %vm1019_vm4, %v2532_v35, %v3913_v18  ;;  %v3994_v18 = vld [vmem:[%s4927_s5 + $0x88] sm:$0xff]   ;;  %v3995_v33 = vld [vmem:[%s4927_s5 + $0xd0] sm:$0xff]   ;;  %v3997_v35 = vld [vmem:[%s4927_s5 + $0xd8] sm:$0xff]  }
0x14a9   :  { %v3998_v36 = vld [vmem:[%s4927_s5 + $0x98] sm:$0xff]  }
0x14ac   :  { %v4096_v7 = vpop.eup %4095 }
0x14ad   :  { %v2413_v5 = vsel %vm204_vm1, %v4096_v7, 0.0  ;;  %v4098_v11 = vpop.eup %4097 }
0x14ae   :  { %2414 = vadd.xlane.f32.xlu0 %v2413_v5  ;;  %v2410_v12 = vsel %vm204_vm1, %v4098_v11, 0.0  ;;  %v3987_v5 = vld [vmem:[%s4926_s4 + $0x64] ss:$8 sps:$4 sm:$0xff]  }
0x14b2   :  { %2411 = vadd.xlane.f32.xlu0 %v2410_v12  ;;  %v3988_v12 = vld [vmem:[%s4926_s4 + $0x70] ss:$8 sps:$4 sm:$0xff]  }
0x14c8   :  { %3900 = vrot.lane.b32.xlu0 %v4611_v55, %s4158_s26  ;;  %v3975_v55 = vld [vmem:[%s4925_s3 + $0x20] sm:$0xff]  }
0x153b   :  { %v2415_v51 = vpop.xlane.xlu0 %2414 }
0x153c   :  { %4099 = vrcp.f32 %v2415_v51  ;;  %v3990_v51 = vld [vmem:[%s4926_s4 + $0x74] ss:$8 sps:$4 sm:$0xff]  }
0x153f   :  { %v2412_v14 = vpop.xlane.xlu0 %2411 }
0x1540   :  { %4101 = vrcp.f32 %v2412_v14 }
0x1543   :  { %v3901_v15 = vpop.permute.xlu0 %3900 }
0x1544   :  { %v3903_v3 = vunpack.i.h.bf16 %v3901_v15  ;;  %v3902_v63 = vunpack.i.l.bf16 %v3901_v15 }
0x1546   :  { %v3802_v17 = vpack.c.bf16 %v3903_v3, %v3902_v63  ;;  %v4100_v19 = vpop.eup %4099 }
0x1547   :  { %v2419_v23 = vmul.f32 %v4100_v19, %v4096_v7  ;;  %v3982_v7 = vld [vmem:[%s4926_s4 + $0x50] ss:$8 sps:$4 sm:$0xff]  }
0x1548   :  { %3803 = vmatprep.subr.bf16.mxu0 %v3802_v17  ;;  %2742 = vmatpush1.bf16.msra.mxu1 %v3982_v7 }
0x1549   :  { %3805 = vmatpush3.bf16.msra.mxu0 %v3802_v17  ;;  %2743 = vmatprep.subr.bf16.mxu1 %v3987_v5 }
0x154a   :  { %v4102_v20 = vpop.eup %4101  ;;  %3702 = vmatprep.subr.bf16.mxu0 %v4161_v13 }
0x154b   :  { %v2418_v21 = vmul.f32 %v4102_v20, %v4098_v11  ;;  %v3985_v11 = vld [vmem:[%s4926_s4 + $0x60] ss:$8 sps:$4 sm:$0xff]   ;;  %s3211_s4 = sshll.u32 %s4163_s25, 4  ;;  %s3212_s4 = int_to_ptr.vmem [resolvable:$true] %s3211_s4 }
0x154c   :  { %2744 = vmatpush1.bf16.msra.mxu1 %v3985_v11  ;;  %p4134_p1 = scmp.lt.s32.totalorder %s3212_s4, %s3212_s4 }
0x154d   :  { %3699 = vmatprep.mubr.msk.f32.mxu0 %vm204_vm1, %v2418_v21  ;;  %2745 = vmatprep.subr.bf16.mxu1 %v3990_v51 }
0x154e   :  { %3700 = vmatmul.mubr.msk.f32.vlgmr.msra.gmra.mrb[24].mxu0 %vm204_vm1, %v2419_v23  ;;  %v3367_v23 = vld [vmem:[%s4929_s7 + $0x9] ss:$0 sm:$0xff] }
0x154f   :  { %3710 = vmatprep.mubr.msk.bf16.mxu0 %vm4162_vm3, %v4161_v13  ;;  %3703 = vmatpush3.bf16.msra.mxu0 %v3975_v55 }
0x1550   :  { %3704 = vmatprep.subr.bf16.mxu0 %v4161_v13  ;;  %2746 = vmatpush1.bf16.msra.mxu1 %v3988_v12 }
0x1551   :  { %3714 = vmatprep.subr.bf16.mxu1 %v4161_v13 }
0x1553   :  { %3705 = vmatpush3.bf16.msra.mxu0 %v3976_v24 }
0x1554   :  { %3706 = vmatprep.subr.bf16.mxu0 %v4161_v13 }
0x1557   :  { %3707 = vmatpush3.bf16.msra.mxu0 %v3977_v26 }
0x1558   :  { %3708 = vmatprep.subr.bf16.mxu0 %v4161_v13 }
0x155b   :  { %3709 = vmatpush3.bf16.msra.mxu0 %v3978_v27  ;;  %v3368_v27 = vld [vmem:[%s4929_s7 + $0xa] ss:$0 sm:$0xff] }
0x155c   :  { %3551 = vmatprep.subr.bf16.mxu0 %v3991_v16 }
0x1621   :  { %v3701_v28 = vpop.f32.mrb[24].mxu0 }
0x1622   :  { %v2498_v50 = vpop.f32.mrb[25].mxu0 }
0x1623   :  { %v3914_v29 = vpack.i.bf16 %v3701_v28, %v2498_v50 }
0x1625   :  { %3915 = vrot.lane.b32.xlu1 %v3914_v29, %s4159_s12 }
0x1697   :  { %v3916_v34 = vpop.permute.xlu1 %3915 }
0x1698   :  { %v3918_v47 = vunpack.i.h.bf16 %v3916_v34  ;;  %v3917_v25 = vunpack.i.l.bf16 %v3916_v34  ;;  %v3996_v34 = vld [vmem:[%s4927_s5 + $0x90] sm:$0xff]  }
0x169a   :  { %v2536_v0 = vsel %vm1022_vm5, %v2534_v39, %v3918_v47  ;;  %v2535_v40 = vsel %vm1022_vm5, %v2533_v37, %v3917_v25  ;;  %v3999_v47 = vld [vmem:[%s4927_s5 + $0xe0] sm:$0xff]   ;;  %v4001_v37 = vld [vmem:[%s4927_s5 + $0xe8] sm:$0xff]  }
0x169b   :  { %v2546_v41 = vpack.c.bf16 %v2536_v0, %v2535_v40  ;;  %v4000_v25 = vld [vmem:[%s4927_s5 + $0xa0] sm:$0xff]   ;;  %v4002_v39 = vld [vmem:[%s4927_s5 + $0xa8] sm:$0xff]   ;;  %v4003_v0 = vld [vmem:[%s4927_s5 + $0xf0] sm:$0xff]  }
0x169c   :  { %v4004_v40 = vld [vmem:[%s4927_s5 + $0xb0] sm:$0xff]  }
0x169d   :  { %3711 = vmatmul.mubr.msk.bf16.vlgmr.msra.gmra.mrb[28].mxu0 %vm47_vm0, %v2546_v41  ;;  %v4005_v41 = vld [vmem:[%s4927_s5 + $0xf8] sm:$0xff]  }
0x169e   :  { %3552 = vmatpush3.bf16.msra.mxu0 %v3992_v30 }
0x169f   :  { %3553 = vmatprep.subr.bf16.mxu0 %v3993_v31 }
0x16a2   :  { %3554 = vmatpush3.bf16.msra.mxu0 %v3994_v18 }
0x16a3   :  { %3555 = vmatprep.subr.bf16.mxu0 %v3995_v33 }
0x16a6   :  { %3556 = vmatpush3.bf16.msra.mxu0 %v3996_v34 }
0x16a7   :  { %3557 = vmatprep.subr.bf16.mxu0 %v3997_v35 }
0x16aa   :  { %3558 = vmatpush3.bf16.msra.mxu0 %v3998_v36 }
0x16ab   :  { %3559 = vmatprep.subr.bf16.mxu0 %v3999_v47 }
0x16ae   :  { %3560 = vmatpush3.bf16.msra.mxu0 %v4000_v25 }
0x16af   :  { %3561 = vmatprep.subr.bf16.mxu0 %v4001_v37 }
0x16b2   :  { %3562 = vmatpush3.bf16.msra.mxu0 %v4002_v39 }
0x16b3   :  { %3563 = vmatprep.subr.bf16.mxu0 %v4003_v0 }
0x16b6   :  { %3564 = vmatpush3.bf16.msra.mxu0 %v4004_v40 }
0x16b7   :  { %3565 = vmatprep.subr.bf16.mxu0 %v4005_v41 }
0x1770   :  { %v2608_v58 = vpop.f32.mrb[28].mxu0 }
0x1771   :  { %v2615_v32 = vadd.f32 %v2608_v58, %v4552_v1  ;;  %v3712_v46 = vpop.f32.mrb[29].mxu0  ;;  %v4006_v58 = vld [vmem:[%s4927_s5 + $0xb8] sm:$0xff]  }
0x1772   :  { %v2611_v45 = vpop.f32.mrb[30].mxu0  ;;  %3566 = vmatpush3.bf16.msra.mxu0 %v4006_v58 }
0x1773   :  { %v4744_v60 = vadd.f32 %v3364_v38, %v2615_v32  ;;  %v2616_v49 = vadd.f32 %v2611_v45, %v4555_v4  ;;  %v3713_v57 = vpop.f32.mrb[31].mxu0 }
0x1775   :  { %v4747_v52 = vadd.f32 %v3364_v38, %v2616_v49  ;;  %v2631_v54 = vsel %vm47_vm0, %v4744_v60, 0.0  ;;  %v3377_v38 = vld [vmem:[%s4931_s9 + $0x2] sm:$0x3] }
0x1776   :  { %2632 = vadd.xlane.f32.xlu0 %v2631_v54  ;;  %v2689_v32 = vrot.slane %v3377_v38, %v4276_v42  ;;  %v2693_v46 = vrot.slane %v3377_v38, %v4281_v44 }
0x1777   :  { %v2634_v53 = vsel %vm47_vm0, %v4747_v52, 0.0 }
0x1778   :  { %2635 = vadd.xlane.f32.xlu1 %v2634_v53 }
0x1803   :  { %v2633_v2 = vpop.xlane.xlu0 %2632 }
0x1804   :  { %v2637_v56 = vmul.f32 0.015625, %v2633_v2 }
0x1805   :  { %v2636_v1 = vpop.xlane.xlu1 %2635 }
0x1806   :  { %v2639_v61 = vsub.f32 %v4744_v60, %v2637_v56  ;;  %v2638_v59 = vmul.f32 0.015625, %v2636_v1 }
0x1808   :  { %v2640_v62 = vsub.f32 %v4747_v52, %v2638_v59  ;;  %v2641_v4 = vmul.f32 %v2639_v61, %v2639_v61 }
0x180a   :  { %v2643_v22 = vsel %vm47_vm0, %v2641_v4, 0.0  ;;  %v2642_v6 = vmul.f32 %v2640_v62, %v2640_v62 }
0x180b   :  { %2644 = vadd.xlane.f32.xlu0 %v2643_v22 }
0x180c   :  { %v2646_v8 = vsel %vm47_vm0, %v2642_v6, 0.0 }
0x180f   :  { %2647 = vadd.xlane.f32.xlu0 %v2646_v8 }
0x1898   :  { %v2645_v14 = vpop.xlane.xlu0 %2644 }
0x1899   :  { %v2649_v15 = vmul.f32 0.015625, %v2645_v14 }
0x189b   :  { %v2651_v3 = vadd.f32 1e-05, %v2649_v15 }
0x189c   :  { %v2648_v63 = vpop.xlane.xlu0 %2647 }
0x189d   :  { %4103 = vrsqrt.f32 %v2651_v3  ;;  %v2650_v17 = vmul.f32 0.015625, %v2648_v63 }
0x189f   :  { %v2652_v19 = vadd.f32 1e-05, %v2650_v17 }
0x18a1   :  { %4105 = vrsqrt.f32 %v2652_v19 }
0x18a7   :  { %v4104_v20 = vpop.eup %4103 }
0x18a8   :  { %v2655_v21 = vmul.f32 %v4104_v20, %v2639_v61 }
0x18aa   :  { %v2663_v24 = vmul.f32 %v3367_v23, %v2655_v21 }
0x18ab   :  { %v4106_v55 = vpop.eup %4105 }
0x18ac   :  { %v2656_v26 = vmul.f32 %v4106_v55, %v2640_v62  ;;  %v2671_v50 = vadd.f32 %v3368_v27, %v2663_v24 }
0x18ae   :  { %v2664_v28 = vmul.f32 %v3367_v23, %v2656_v26 }
0x18b0   :  { %v2672_v29 = vadd.f32 %v3368_v27, %v2664_v28 }
0x18b2   :  { %v2682_v43 = vpack.c.bf16 %v2672_v29, %v2671_v50 }
0x18b4   :  { %3386 = vmatmul.mubr.msk.bf16.vlgmr.msra.gmra.mrb[28].mxu1 %vm47_vm0, %v2682_v43 }
0x18b5   :  { %3722 = vmatprep.mubr.msk.bf16.mxu1 %vm4162_vm3, %v4161_v13 }
0x1987   :  { %v2773_v45 = vpop.f32.mrb[28].mxu1 }
0x1988   :  { %v4844_v49 = vadd.f32 %v2773_v45, %v2689_v32  ;;  %v2775_v57 = vpop.f32.mrb[29].mxu1 }
0x1989   :  { %v4846_v54 = vadd.f32 %v2775_v57, %v2693_v46  ;;  %v2777_v53 = vpop.f32.mrb[30].mxu1 }
0x198a   :  { %v4849_v2 = vmul.f32 0.70710677, %v4844_v49  ;;  %v4851_v56 = vadd.f32 %v2777_v53, %v2689_v32  ;;  %v2779_v1 = vpop.f32.mrb[31].mxu1 }
0x198b   :  { %v4854_v61 = vmul.f32 0.70710677, %v4846_v54  ;;  %v4856_v59 = vadd.f32 %v2779_v1, %v2693_v46 }
0x198c   :  { %v2790_v42 = vand.u32 2147483647, %v4849_v2  ;;  %v4860_v44 = vmul.f32 0.70710677, %v4851_v56  ;;  %vm2870_vm10 = vcmp.lt.f32.partialorder %v4849_v2, 0.0 }
0x198d   :  { %v2791_v62 = vand.u32 2147483647, %v4854_v61  ;;  %v4864_v4 = vmul.f32 0.70710677, %v4856_v59  ;;  %vm2871_vm11 = vcmp.lt.f32.partialorder %v4854_v61, 0.0 }
0x198e   :  { %v2794_v22 = vmul.f32 0.3275911, %v2790_v42  ;;  %v2792_v6 = vand.u32 2147483647, %v4860_v44  ;;  %v2846_v51 = vsub.f32 0.0, %v2790_v42  ;;  %vm2872_vm12 = vcmp.lt.f32.partialorder %v4860_v44, 0.0 }
0x198f   :  { %v2795_v8 = vmul.f32 0.3275911, %v2791_v62  ;;  %v2793_v9 = vand.u32 2147483647, %v4864_v4  ;;  %v2847_v14 = vsub.f32 0.0, %v2791_v62  ;;  %vm2873_vm13 = vcmp.lt.f32.partialorder %v4864_v4, 0.0 }
0x1990   :  { %v2798_v48 = vadd.f32 1.0, %v2794_v22  ;;  %v2796_v10 = vmul.f32 0.3275911, %v2792_v6  ;;  %v2850_v3 = vmul.f32 %v2846_v51, %v2790_v42  ;;  %v2848_v63 = vsub.f32 0.0, %v2792_v6 }
0x1991   :  { %v2799_v7 = vadd.f32 1.0, %v2795_v8  ;;  %v2797_v5 = vmul.f32 0.3275911, %v2793_v9  ;;  %v2851_v20 = vmul.f32 %v2847_v14, %v2791_v62  ;;  %v2849_v23 = vsub.f32 0.0, %v2793_v9 }
0x1992   :  { %4107 = vrcp.f32 %v2798_v48  ;;  %v2800_v11 = vadd.f32 1.0, %v2796_v10  ;;  %v2854_v26 = vmul.f32 1.442695, %v2850_v3  ;;  %v2852_v28 = vmul.f32 %v2848_v63, %v2792_v6 }
0x1993   :  { %4109 = vrcp.f32 %v2799_v7  ;;  %v2801_v12 = vadd.f32 1.0, %v2797_v5  ;;  %v2856_v29 = vmul.f32 1.442695, %v2851_v20  ;;  %v2853_v31 = vmul.f32 %v2849_v23, %v2793_v9 }
0x1994   :  { %4111 = vrcp.f32 %v2800_v11  ;;  %v2858_v36 = vmul.f32 1.442695, %v2852_v28 }
0x1995   :  { %4113 = vrcp.f32 %v2801_v12  ;;  %v2860_v0 = vmul.f32 1.442695, %v2853_v31 }
0x1996   :  { %4115 = vpow2.f32 %v2854_v26 }
0x1997   :  { %4117 = vpow2.f32 %v2856_v29 }
0x1998   :  { %4119 = vpow2.f32 %v2858_v36  ;;  %v2785_v36 = vmul.f32 0.5, %v4856_v59 }
0x1999   :  { %4121 = vpow2.f32 %v2860_v0 }
0x199c   :  { %v4108_v15 = vpop.eup %4107 }
0x199d   :  { %v4110_v17 = vpop.eup %4109  ;;  %v2810_v19 = vmul.f32 1.0614054, %v4108_v15 }
0x199e   :  { %v2811_v21 = vmul.f32 1.0614054, %v4110_v17  ;;  %v4112_v24 = vpop.eup %4111 }
0x199f   :  { %v3387_v55 = vadd.f32 -1.4531521, %v2810_v19  ;;  %v2812_v43 = vmul.f32 1.0614054, %v4112_v24  ;;  %v4114_v16 = vpop.eup %4113 }
0x19a0   :  { %v3388_v27 = vadd.f32 -1.4531521, %v2811_v21  ;;  %v2813_v34 = vmul.f32 1.0614054, %v4114_v16  ;;  %v4116_v9 = vpop.eup %4115 }
0x19a1   :  { %v2818_v50 = vmul.f32 %v4108_v15, %v3387_v55  ;;  %v3389_v33 = vadd.f32 -1.4531521, %v2812_v43  ;;  %v4118_v10 = vpop.eup %4117 }
0x19a2   :  { %v2819_v30 = vmul.f32 %v4110_v17, %v3388_v27  ;;  %v3390_v37 = vadd.f32 -1.4531521, %v2813_v34  ;;  %v4120_v63 = vpop.eup %4119 }
0x19a3   :  { %v2822_v18 = vadd.f32 1.4214138, %v2818_v50  ;;  %v2820_v25 = vmul.f32 %v4112_v24, %v3389_v33  ;;  %v4122_v55 = vpop.eup %4121  ;;  %v2783_v33 = vmul.f32 0.5, %v4846_v54  ;;  %v3444_v54 = vld [vmem:[%s4929_s7 + $0xb] ss:$0 sm:$0xff] }
0x19a4   :  { %v2823_v35 = vadd.f32 1.4214138, %v2819_v30  ;;  %v2821_v58 = vmul.f32 %v4114_v16, %v3390_v37 }
0x19a5   :  { %v2826_v47 = vmul.f32 %v4108_v15, %v2822_v18  ;;  %v2824_v41 = vadd.f32 1.4214138, %v2820_v25  ;;  %v2784_v18 = vmul.f32 0.5, %v4851_v56 }
0x19a6   :  { %v2827_v39 = vmul.f32 %v4110_v17, %v2823_v35  ;;  %v2825_v45 = vadd.f32 1.4214138, %v2821_v58 }
0x19a7   :  { %v3391_v40 = vadd.f32 -0.28449672, %v2826_v47  ;;  %v2828_v46 = vmul.f32 %v4112_v24, %v2824_v41 }
0x19a8   :  { %v3392_v38 = vadd.f32 -0.28449672, %v2827_v39  ;;  %v2829_v42 = vmul.f32 %v4114_v16, %v2825_v45 }
0x19a9   :  { %v2834_v32 = vmul.f32 %v4108_v15, %v3391_v40  ;;  %v3393_v1 = vadd.f32 -0.28449672, %v2828_v46 }
0x19aa   :  { %v2835_v57 = vmul.f32 %v4110_v17, %v3392_v38  ;;  %v3394_v8 = vadd.f32 -0.28449672, %v2829_v42 }
0x19ab   :  { %v2838_v53 = vadd.f32 0.2548296, %v2834_v32  ;;  %v2836_v6 = vmul.f32 %v4112_v24, %v3393_v1 }
0x19ac   :  { %v2839_v62 = vadd.f32 0.2548296, %v2835_v57  ;;  %v2837_v11 = vmul.f32 %v4114_v16, %v3394_v8 }
0x19ad   :  { %v2842_v22 = vmul.f32 %v4108_v15, %v2838_v53  ;;  %v2840_v5 = vadd.f32 0.2548296, %v2836_v6 }
0x19ae   :  { %v2843_v48 = vmul.f32 %v4110_v17, %v2839_v62  ;;  %v2841_v3 = vadd.f32 0.2548296, %v2837_v11 }
0x19af   :  { %v2862_v7 = vmul.f32 %v4116_v9, %v2842_v22  ;;  %v2844_v14 = vmul.f32 %v4112_v24, %v2840_v5  ;;  %v2782_v24 = vmul.f32 0.5, %v4844_v49  ;;  %v4007_v9 = vld [vmem:[%s4928_s6] sm:$0xff]  }
0x19b0   :  { %v2863_v12 = vmul.f32 %v4118_v10, %v2843_v48  ;;  %v2845_v23 = vmul.f32 %v4114_v16, %v2841_v3  ;;  %3715 = vmatpush3.bf16.msra.mxu1 %v4007_v9  ;;  %v4008_v48 = vld [vmem:[%s4928_s6 + $0x8] sm:$0xff]   ;;  %v4009_v10 = vld [vmem:[%s4928_s6 + $0x10] sm:$0xff]  }
0x19b1   :  { %v2866_v51 = vsub.f32 1.0, %v2862_v7  ;;  %v2864_v21 = vmul.f32 %v4120_v63, %v2844_v14  ;;  %3716 = vmatprep.subr.bf16.mxu1 %v4161_v13  ;;  %v4010_v7 = vld [vmem:[%s4928_s6 + $0x18] sm:$0xff]  }
0x19b2   :  { %v2867_v19 = vsub.f32 1.0, %v2863_v12  ;;  %v2865_v17 = vmul.f32 %v4122_v55, %v2845_v23  ;;  %v3448_v55 = vld [vmem:[%s4929_s7 + $0xd] ss:$0 sm:$0xff] }
0x19b3   :  { %v2874_v20 = vsub.f32 0.0, %v2866_v51  ;;  %v2868_v27 = vsub.f32 1.0, %v2864_v21 }
0x19b4   :  { %v2875_v15 = vsub.f32 0.0, %v2867_v19  ;;  %v2869_v29 = vsub.f32 1.0, %v2865_v17  ;;  %3717 = vmatpush3.bf16.msra.mxu1 %v4008_v48 }
0x19b5   :  { %v2878_v26 = vsel %vm2870_vm10, %v2874_v20, %v2866_v51  ;;  %v2876_v50 = vsub.f32 0.0, %v2868_v27  ;;  %3718 = vmatprep.subr.bf16.mxu1 %v4161_v13 }
0x19b6   :  { %v2879_v28 = vsel %vm2871_vm11, %v2875_v15, %v2867_v19  ;;  %v2882_v43 = vadd.f32 1.0, %v2878_v26  ;;  %v2877_v31 = vsub.f32 0.0, %v2869_v29  ;;  %v3447_v19 = vld [vmem:[%s4929_s7 + $0xc] ss:$0 sm:$0xff]  ;;  %s4129_s7 = scalar_lea.vmem %s3212_s4, 256 }
0x19b7   :  { %v2880_v30 = vsel %vm2872_vm12, %v2876_v50, %v2868_v27  ;;  %v2883_v16 = vadd.f32 1.0, %v2879_v28  ;;  %v3449_v28 = vld [vmem:[%s4932_s10] ss:$0 sm:$0xff]  ;;  %p4130_p0 = scmp.ne.s32.totalorder %s3212_s4, %s4129_s7  ;;  %p4135_p2 = scmp.lt.s32.totalorder %s4129_s7, %s4129_s7 }
0x19b8   :  { %v2884_v2 = vadd.f32 1.0, %v2880_v30  ;;  %v2881_v34 = vsel %vm2873_vm13, %v2877_v31, %v2869_v29  ;;  %v2886_v61 = vmul.f32 %v2882_v43, %v2782_v24  ;;  %3719 = vmatpush3.bf16.msra.mxu1 %v4009_v10 }
0x19b9   :  { %v2885_v47 = vadd.f32 1.0, %v2881_v34  ;;  %v2887_v25 = vmul.f32 %v2883_v16, %v2783_v33  ;;  %3720 = vmatprep.subr.bf16.mxu1 %v4161_v13  ;;  %p4136_p3 = por %p4135_p2, %p4134_p1 }
0x19ba   :  { %v2888_v35 = vmul.f32 %v2884_v2, %v2784_v18 }
0x19bb   :  { %v2889_v37 = vmul.f32 %v2885_v47, %v2785_v36  ;;  %p4137_p4 = pnand %p4136_p3, %p4130_p0 }
0x19bc   :  { %v2923_v44 = vpack.c.bf16 %v2888_v35, %v2886_v61  ;;  %3721 = vmatpush3.bf16.msra.mxu1 %v4010_v7 }
0x19bd   :  { %v2924_v49 = vpack.c.bf16 %v2889_v37, %v2887_v25 }
0x19bf   :  { %3053 = vmatprep.mubr.bf16.mxu0 %v2924_v49 }
0x19c0   :  { %3054 = vmatmul.mubr.bf16.vlgmr.msra.gmra.mrb[32].mxu0 %v2923_v44 }
0x1a93   :  { %v3567_v39 = vpop.f32.mrb[32].mxu0 }
0x1a94   :  { %v3568_v0 = vpop.f32.mrb[33].mxu0 }
0x1a95   :  { %v3569_v56 = vadd.f32 %v3568_v0, %v3567_v39  ;;  %v3570_v40 = vpop.f32.mrb[34].mxu0 }
0x1a96   :  { %v3571_v41 = vpop.f32.mrb[35].mxu0 }
0x1a97   :  { %v3062_v4 = vadd.f32 %v3569_v56, %v4744_v60  ;;  %v3572_v58 = vadd.f32 %v3571_v41, %v3570_v40 }
0x1a99   :  { %v3063_v59 = vadd.f32 %v3572_v58, %v4747_v52  ;;  %v3072_v38 = vadd.f32 %v3444_v54, %v3062_v4 }
0x1a9b   :  { %v3078_v32 = vsel %vm47_vm0, %v3072_v38, 0.0  ;;  %v3073_v46 = vadd.f32 %v3444_v54, %v3063_v59 }
0x1a9c   :  { %3079 = vadd.xlane.f32.xlu0 %v3078_v32 }
0x1a9d   :  { %v3081_v45 = vsel %vm47_vm0, %v3073_v46, 0.0 }
0x1a9e   :  { %3082 = vadd.xlane.f32.xlu1 %v3081_v45 }
0x1b29   :  { %v3080_v57 = vpop.xlane.xlu0 %3079 }
0x1b2a   :  { %v3084_v53 = vmul.f32 0.015625, %v3080_v57 }
0x1b2b   :  { %v3083_v1 = vpop.xlane.xlu1 %3082 }
0x1b2c   :  { %v3086_v42 = vsub.f32 %v3072_v38, %v3084_v53  ;;  %v3085_v62 = vmul.f32 0.015625, %v3083_v1 }
0x1b2e   :  { %v3087_v22 = vsub.f32 %v3073_v46, %v3085_v62  ;;  %v3088_v6 = vmul.f32 %v3086_v42, %v3086_v42 }
0x1b30   :  { %v3090_v60 = vsel %vm47_vm0, %v3088_v6, 0.0  ;;  %v3089_v8 = vmul.f32 %v3087_v22, %v3087_v22 }
0x1b31   :  { %3091 = vadd.xlane.f32.xlu0 %v3090_v60 }
0x1b32   :  { %v3093_v52 = vsel %vm47_vm0, %v3089_v8, 0.0 }
0x1b33   :  { %3094 = vadd.xlane.f32.xlu1 %v3093_v52 }
0x1bbe   :  { %v3092_v5 = vpop.xlane.xlu0 %3091 }
0x1bbf   :  { %v3096_v11 = vmul.f32 0.015625, %v3092_v5 }
0x1bc0   :  { %v3095_v12 = vpop.xlane.xlu1 %3094 }
0x1bc1   :  { %v3098_v51 = vadd.f32 1e-05, %v3096_v11  ;;  %v3097_v14 = vmul.f32 0.015625, %v3095_v12 }
0x1bc3   :  { %4123 = vrsqrt.f32 %v3098_v51  ;;  %v3099_v3 = vadd.f32 1e-05, %v3097_v14 }
0x1bc5   :  { %4125 = vrsqrt.f32 %v3099_v3 }
0x1bcd   :  { %v4124_v63 = vpop.eup %4123 }
0x1bce   :  { %v3102_v20 = vmul.f32 %v4124_v63, %v3086_v42 }
0x1bcf   :  { %v4126_v13 = vpop.eup %4125 }
0x1bd0   :  { %v3110_v21 = vmul.f32 %v3447_v19, %v3102_v20  ;;  %v3103_v23 = vmul.f32 %v4126_v13, %v3087_v22 }
0x1bd2   :  { %v3111_v15 = vmul.f32 %v3447_v19, %v3103_v23  ;;  %v3118_v26 = vadd.f32 %v3448_v55, %v3110_v21 }
0x1bd4   :  { %v3119_v27 = vadd.f32 %v3448_v55, %v3111_v15 }
0x1bd6   :  { %v3128_v17 = vpack.c.bf16 %v3119_v27, %v3118_v26 }
0x1bd8   :  { %3723 = vmatmul.mubr.msk.bf16.vlgmr.msra.gmra.mrb[32].mxu1 %vm47_vm0, %v3128_v17 }
0x1cab   :  { %v3197_v50 = vpop.f32.mrb[32].mxu1 }
0x1cac   :  { %v3198_v29 = vadd.f32 %v3449_v28, %v3197_v50  ;;  %v3724_v43 = vpop.f32.mrb[33].mxu1 }
0x1cad   :  { %v3200_v24 = vpop.f32.mrb[34].mxu1 }
0x1cae   :  { %3204 = vst [vmem:[#allocation2] sm:$0xff] %v3198_v29  ;;  %v3201_v30 = vadd.f32 %v3449_v28, %v3200_v24  ;;  %v3725_v31 = vpop.f32.mrb[35].mxu1 }
0x1cb0   :  { %3205 = vst [vmem:[#allocation2 + $0x8] sm:$0xff] %v3201_v30 }
0x1cb1   :  { %4140 = shalt.err (!%p4137_p4)
}
0x1cb2   :  { %s4141_s13 = scalar_lea.hbm %s4933_s11, 256 }
0x1cb3   :  { %p4142_p5 = scmp.ne.s32.totalorder %s4933_s11, %s4141_s13  ;;  %p4145_p6 = scmp.lt.u32.totalorder %s4141_s13, %s4933_s11 }
0x1cb5   :  { %p4147_p7 = pnand %p4145_p6, %p4142_p5 }
0x1cb7   :  { %4150 = shalt.err (!%p4147_p7)
}
0x1cb8   :  { %s4164_s14 = smov 128   ;;  %s4165_s15 = smov 8  }
0x1cb9   :  { %3217 = dma.vmem_to_hbm [thread:$0]  %s3212_s4, 256, %s4933_s11, [#allocation3], %s4164_s14, %s4164_s14, %s4165_s15  }
0x1cba   :  { %4151 = dma.done.wait [#allocation3], 256  }
0x1cbb   :  { %4152 = vsyncadd [#allocation3], 4294967040 }
0x1cbc   :  { %3221 = vsyncpa [#allocation3], 1 }

</bundles_post_ra>
